<compile_context>
chip_gen: v5e
topology: v5e:2x2
jax: 0.10.0
libtpu: 0.0.40
codegen_flags: <defaults>
</compile_context>

<pallas_src>
import jax
import jax.numpy as jnp
from jax import lax
from jax.experimental import pallas as pl
from jax.experimental.pallas import tpu as pltpu


def emotionnet_kernel(src2_ref, enc_wih_ref, enc_whh_ref, enc_b_ref,
                      dec_wih_ref, dec_fused_ref, dec_b_ref, fc_b_ref,
                      out_ref, h_out_ref, c_out_ref):
    S, B, OP = out_ref.shape          # OP = lane-padded output width (>= output_dim)
    G = enc_whh_ref.shape[0]          # G = 4*H (recurrent gate width, lane-padded state)
    H = G // 4
    f32 = jnp.float32

    # ---- loop-invariant tensors, hoisted (JAX does not CSE broadcast_in_dim) ----
    lane_g = lax.broadcasted_iota(jnp.int32, (B, G), 1)
    g_mask = (lane_g >= 2 * H) & (lane_g < 3 * H)          # lanes of the tanh ("g") gate
    # packed-argmax tie-break term: larger for smaller lane -> first-occurrence semantics
    tie = (OP - 1) - lax.broadcasted_iota(jnp.int32, (B, OP), 1)

    dec_b = jnp.broadcast_to(dec_b_ref[...], (B, G))
    dec_wih = jnp.broadcast_to(dec_wih_ref[...], (B, G))
    fc_b = jnp.broadcast_to(fc_b_ref[...], (B, OP))
    enc_whh = enc_whh_ref[...]        # (G, G), rows [H:G) are zero
    dec_fused = dec_fused_ref[...]    # (G, G+OP) = [dec_whh | fc_w], rows [H:G) are zero

    def cell(gates, c):
        # gates already include x-projection + h@whh + bias. PyTorch gate order: i,f,g,o.
        # tanh(x) = 2*sigmoid(2x) - 1  -> a single EUP pass over the full (B, G) vreg.
        gs = jnp.where(g_mask, gates + gates, gates)
        sig = jax.nn.sigmoid(gs)
        act = jnp.where(g_mask, sig + sig - 1.0, sig)      # [ i | f | g | o ]
        f_al = pltpu.roll(act, shift=3 * H, axis=1)        # lanes [0,H) = f
        g_al = pltpu.roll(act, shift=2 * H, axis=1)        # lanes [0,H) = g
        o_al = pltpu.roll(act, shift=H, axis=1)            # lanes [0,H) = o
        c_new = f_al * c + act * g_al                      # valid in [0,H); rest bounded garbage
        h_new = o_al * jnp.tanh(c_new)
        return h_new, c_new

    # ---------------- Encoder ----------------
    # Hoisted input projection + bias fold: one (S*B, I) @ (I, G) matmul + one add,
    # both off the recurrent critical path.
    xg_all = (jnp.dot(src2_ref[...], enc_wih_ref[...], preferred_element_type=f32)
              + jnp.broadcast_to(enc_b_ref[...], (S * B, G)))          # (S*B, G)

    h = jnp.zeros((B, G), f32)
    c = jnp.zeros((B, G), f32)

    # Fully unrolled (S is a small static trip count) -> static slices / stores.
    for t in range(S):
        gates = xg_all[t * B:(t + 1) * B, :] + jnp.dot(
            h, enc_whh, preferred_element_type=f32)
        h, c = cell(gates, c)

    # outputs = zeros(S, B, O); only row 0 keeps the zeros, rows 1..S-1 are overwritten.
    out_ref[0] = jnp.zeros((B, OP), f32)

    # ---------------- Decoder (autoregressive, eval mode) ----------------
    # hw = h @ [dec_whh | fc_w]: cols [0,G) feed the NEXT step's gates, cols [G,G+OP)
    # are the CURRENT step's logits -> one MXU pass per serial step.
    hw = jnp.dot(h, dec_fused, preferred_element_type=f32)             # (B, G+OP)
    xg = dec_b - dec_wih                                               # inp = -1 at t=1
    for t in range(1, S):
        gates = xg + hw[:, :G]
        h, c = cell(gates, c)
        hw = jnp.dot(h, dec_fused, preferred_element_type=f32)         # fused gates+logits
        logits = hw[:, G:] + fc_b                                      # (B, OP) lane-dense
        out_ref[t] = logits
        if t < S - 1:
            # Single-pass argmax: order-preserving f32 -> int32 key, truncate the low
            # 7 bits and pack the complemented lane index there, one int max reduce.
            # Padded lanes hold exactly -1e30 (most-negative key) so they never win.
            b = pltpu.bitcast(logits, jnp.int32)
            key = jnp.where(b >= 0, b, -(b & jnp.int32(0x7FFFFFFF)))
            packed = ((key >> 7) << 7) | tie
            best = jnp.max(packed, axis=1, keepdims=True)              # one XLU reduce
            idx = (OP - 1) - (best & jnp.int32(127))                   # (B, 1) int32
            xg = idx.astype(f32) * dec_wih + dec_b                     # next-step input proj

    h_out_ref[...] = h
    c_out_ref[...] = c


def emotionnet_forward(src, params):
    """src: (S, B, I) float32. Returns (outputs (S,B,O), (hidden (B,H), cell (B,H)))."""
    S, B, I = src.shape
    H = params["enc_whh"].shape[0]
    O = params["fc_w"].shape[1]
    G = 4 * H
    OP = max(128, ((O + 127) // 128) * 128)            # lane-dense padded output width
    f32 = jnp.float32

    # ---- one-time param prep: zero-row-pad recurrent weights, fuse decoder fc into the
    # recurrent RHS, lane-pad fc output (padded logit lanes get -1e30 bias) ----
    enc_whh_pad = jnp.zeros((G, G), f32).at[:H, :].set(params["enc_whh"])
    dec_whh_pad = jnp.zeros((G, G), f32).at[:H, :].set(params["dec_whh"])
    fc_w_pad = jnp.zeros((G, OP), f32).at[:H, :O].set(params["fc_w"])
    dec_fused = jnp.concatenate([dec_whh_pad, fc_w_pad], axis=1)       # (G, G+OP)
    fc_b_pad = jnp.full((1, OP), -1e30, f32).at[:, :O].set(params["fc_b"])
    src2d = src.reshape(S * B, I)                      # free metadata reshape in HBM

    ins = (src2d,
           params["enc_wih"], enc_whh_pad, params["enc_b"],
           params["dec_wih"], dec_fused, params["dec_b"], fc_b_pad)

    def full_spec(x):
        nd = x.ndim
        return pl.BlockSpec(x.shape, lambda i, _nd=nd: (0,) * _nd)

    out_shapes = (jax.ShapeDtypeStruct((S, B, OP), f32),
                  jax.ShapeDtypeStruct((B, G), f32),
                  jax.ShapeDtypeStruct((B, G), f32))
    out_specs = (pl.BlockSpec((S, B, OP), lambda i: (0, 0, 0)),
                 pl.BlockSpec((B, G), lambda i: (0, 0)),
                 pl.BlockSpec((B, G), lambda i: (0, 0)))

    out_pad, h_pad, c_pad = pl.pallas_call(
        emotionnet_kernel,
        out_shape=out_shapes,
        grid=(1,),
        in_specs=[full_spec(x) for x in ins],
        out_specs=out_specs,
        compiler_params=pltpu.CompilerParams(dimension_semantics=("arbitrary",)),
    )(*ins)

    return out_pad[:, :, :O], (h_pad[:, :H], c_pad[:, :H])


# ---------------- pure-JAX reference (same math, unpadded) ----------------
def reference_forward(src, p):
    S, B, I = src.shape
    H = p["enc_whh"].shape[0]
    O = p["fc_w"].shape[1]

    def lstm_step(xg, h, c, whh, b):
        g = xg + h @ whh + b
        i = jax.nn.sigmoid(g[:, 0:H]); f = jax.nn.sigmoid(g[:, H:2 * H])
        gg = jnp.tanh(g[:, 2 * H:3 * H]); o = jax.nn.sigmoid(g[:, 3 * H:4 * H])
        c = f * c + i * gg
        return o * jnp.tanh(c), c

    h = jnp.zeros((B, H)); c = jnp.zeros((B, H))
    for t in range(S):
        h, c = lstm_step(src[t] @ p["enc_wih"], h, c, p["enc_whh"], p["enc_b"])
    outputs = [jnp.zeros((B, O))]
    inp = jnp.full((B, 1), -1.0)
    for t in range(1, S):
        h, c = lstm_step(inp * p["dec_wih"], h, c, p["dec_whh"], p["dec_b"])
        logits = h @ p["fc_w"] + p["fc_b"]
        outputs.append(logits)
        inp = jnp.argmax(logits, axis=1).astype(jnp.float32)[:, None]
    return jnp.stack(outputs, 0), (h, c)


if __name__ == "__main__":
    S, B, I, H, O = 8, 2, 4, 32, 3   # seq, batch, input_dim, hidden_dim, output_dim

    key = jax.random.PRNGKey(0)
    ks = jax.random.split(key, 10)
    scale = 1.0 / jnp.sqrt(H)
    params = {
        "enc_wih": jax.random.uniform(ks[0], (I, 4 * H), jnp.float32, -scale, scale),
        "enc_whh": jax.random.uniform(ks[1], (H, 4 * H), jnp.float32, -scale, scale),
        "enc_b":   jax.random.uniform(ks[2], (1, 4 * H), jnp.float32, -scale, scale),
        "dec_wih": jax.random.uniform(ks[3], (1, 4 * H), jnp.float32, -scale, scale),
        "dec_whh": jax.random.uniform(ks[4], (H, 4 * H), jnp.float32, -scale, scale),
        "dec_b":   jax.random.uniform(ks[5], (1, 4 * H), jnp.float32, -scale, scale),
        "fc_w":    jax.random.uniform(ks[6], (H, O), jnp.float32, -scale, scale),
        "fc_b":    jax.random.uniform(ks[7], (1, O), jnp.float32, -scale, scale),
    }
    src = jax.random.normal(ks[8], (S, B, I), jnp.float32)
    trg = jax.random.normal(ks[9], (S, B), jnp.float32)  # unused in eval mode (tf_ratio = 0)

    outputs, (hidden, cell) = emotionnet_forward(src, params)
    jax.block_until_ready((outputs, hidden, cell))

    ref_out, (ref_h, ref_c) = reference_forward(src, params)
    assert jnp.allclose(outputs, ref_out, rtol=1e-4, atol=1e-4)
    assert jnp.allclose(hidden, ref_h, rtol=1e-4, atol=1e-4)
    assert jnp.allclose(cell, ref_c, rtol=1e-4, atol=1e-4)

    print("KERNEL_OK")
</pallas_src>

<mosaic_0001>
module attributes {stable_mosaic.version = 11 : i64} {
  func.func @emotionnet_kernel(%arg0: i32, %arg1: memref<16x4xf32, #tpu.memory_space<vmem>>, %arg2: memref<4x128xf32, #tpu.memory_space<vmem>>, %arg3: memref<128x128xf32, #tpu.memory_space<vmem>>, %arg4: memref<1x128xf32, #tpu.memory_space<vmem>>, %arg5: memref<1x128xf32, #tpu.memory_space<vmem>>, %arg6: memref<128x256xf32, #tpu.memory_space<vmem>>, %arg7: memref<1x128xf32, #tpu.memory_space<vmem>>, %arg8: memref<1x128xf32, #tpu.memory_space<vmem>>, %arg9: memref<8x2x128xf32, #tpu.memory_space<vmem>>, %arg10: memref<2x128xf32, #tpu.memory_space<vmem>>, %arg11: memref<2x128xf32, #tpu.memory_space<vmem>>) attributes {dimension_semantics = [#tpu.dimension_semantics<arbitrary>], iteration_bounds = array<i64: 1>, scalar_prefetch = 0 : i64, scratch_operands = 0 : i64, tpu.core_type = #tpu.core_type<tc>, window_params = [{pipeline_mode = #tpu.pipeline_mode<synchronous>, transform_indices = @transform_0, window_bounds = array<i64: 16, 4>}, {pipeline_mode = #tpu.pipeline_mode<synchronous>, transform_indices = @transform_1, window_bounds = array<i64: 4, 128>}, {pipeline_mode = #tpu.pipeline_mode<synchronous>, transform_indices = @transform_2, window_bounds = array<i64: 128, 128>}, {pipeline_mode = #tpu.pipeline_mode<synchronous>, transform_indices = @transform_3, window_bounds = array<i64: 1, 128>}, {pipeline_mode = #tpu.pipeline_mode<synchronous>, transform_indices = @transform_4, window_bounds = array<i64: 1, 128>}, {pipeline_mode = #tpu.pipeline_mode<synchronous>, transform_indices = @transform_5, window_bounds = array<i64: 128, 256>}, {pipeline_mode = #tpu.pipeline_mode<synchronous>, transform_indices = @transform_6, window_bounds = array<i64: 1, 128>}, {pipeline_mode = #tpu.pipeline_mode<synchronous>, transform_indices = @transform_7, window_bounds = array<i64: 1, 128>}, {pipeline_mode = #tpu.pipeline_mode<synchronous>, transform_indices = @transform_8, window_bounds = array<i64: 8, 2, 128>}, {pipeline_mode = #tpu.pipeline_mode<synchronous>, transform_indices = @transform_9, window_bounds = array<i64: 2, 128>}, {pipeline_mode = #tpu.pipeline_mode<synchronous>, transform_indices = @transform_10, window_bounds = array<i64: 2, 128>}]} {
    %0 = tpu.iota {dimensions = array<i32: 1>} : vector<2x128xi32>
    %c64_i32 = arith.constant 64 : i32
    %1 = vector.broadcast %c64_i32 : i32 to vector<2x128xi32>
    %2 = arith.cmpi sge, %0, %1 : vector<2x128xi32>
    %c96_i32 = arith.constant 96 : i32
    %3 = vector.broadcast %c96_i32 : i32 to vector<2x128xi32>
    %4 = arith.cmpi slt, %0, %3 : vector<2x128xi32>
    %5 = arith.andi %2, %4 : vector<2x128xi1>
    %6 = tpu.iota {dimensions = array<i32: 1>} : vector<2x128xi32>
    %c127_i32 = arith.constant 127 : i32
    %7 = vector.broadcast %c127_i32 : i32 to vector<2x128xi32>
    %8 = arith.subi %7, %6 : vector<2x128xi32>
    %c0 = arith.constant 0 : index
    %c0_0 = arith.constant 0 : index
    %9 = vector.load %arg7[%c0, %c0_0] : memref<1x128xf32, #tpu.memory_space<vmem>>, vector<1x128xf32>
    %10 = vector.shape_cast %9 : vector<1x128xf32> to vector<1x128xf32>
    %11 = vector.broadcast %10 : vector<1x128xf32> to vector<2x128xf32>
    %c0_1 = arith.constant 0 : index
    %c0_2 = arith.constant 0 : index
    %12 = vector.load %arg5[%c0_1, %c0_2] : memref<1x128xf32, #tpu.memory_space<vmem>>, vector<1x128xf32>
    %13 = vector.shape_cast %12 : vector<1x128xf32> to vector<1x128xf32>
    %14 = vector.broadcast %13 : vector<1x128xf32> to vector<2x128xf32>
    %c0_3 = arith.constant 0 : index
    %c0_4 = arith.constant 0 : index
    %15 = vector.load %arg8[%c0_3, %c0_4] : memref<1x128xf32, #tpu.memory_space<vmem>>, vector<1x128xf32>
    %16 = vector.shape_cast %15 : vector<1x128xf32> to vector<1x128xf32>
    %17 = vector.broadcast %16 : vector<1x128xf32> to vector<2x128xf32>
    %c0_5 = arith.constant 0 : index
    %c0_6 = arith.constant 0 : index
    %18 = vector.load %arg3[%c0_5, %c0_6] : memref<128x128xf32, #tpu.memory_space<vmem>>, vector<128x128xf32>
    %c0_7 = arith.constant 0 : index
    %c0_8 = arith.constant 0 : index
    %19 = vector.load %arg6[%c0_7, %c0_8] : memref<128x256xf32, #tpu.memory_space<vmem>>, vector<128x256xf32>
    %c0_9 = arith.constant 0 : index
    %c0_10 = arith.constant 0 : index
    %20 = vector.load %arg1[%c0_9, %c0_10] : memref<16x4xf32, #tpu.memory_space<vmem>>, vector<16x4xf32>
    %c0_11 = arith.constant 0 : index
    %c0_12 = arith.constant 0 : index
    %21 = vector.load %arg2[%c0_11, %c0_12] : memref<4x128xf32, #tpu.memory_space<vmem>>, vector<4x128xf32>
    %cst = arith.constant dense<0.000000e+00> : vector<16x128xf32>
    %22 = tpu.matmul %20, %21, %cst {dimension_numbers = #tpu.dot_dimension_numbers<[1], [0], [0], [1], [0, 0, 1, 1], [], []>} : vector<16x4xf32>, vector<4x128xf32>, vector<16x128xf32> -> vector<16x128xf32>
    %c0_13 = arith.constant 0 : index
    %c0_14 = arith.constant 0 : index
    %23 = vector.load %arg4[%c0_13, %c0_14] : memref<1x128xf32, #tpu.memory_space<vmem>>, vector<1x128xf32>
    %24 = vector.shape_cast %23 : vector<1x128xf32> to vector<1x128xf32>
    %25 = vector.broadcast %24 : vector<1x128xf32> to vector<16x128xf32>
    %26 = arith.addf %22, %25 : vector<16x128xf32>
    %cst_15 = arith.constant 0.000000e+00 : f32
    %27 = vector.broadcast %cst_15 : f32 to vector<2x128xf32>
    %cst_16 = arith.constant 0.000000e+00 : f32
    %28 = vector.broadcast %cst_16 : f32 to vector<2x128xf32>
    %29 = vector.extract_strided_slice %26 {offsets = [0, 0], sizes = [2, 128], strides = [1, 1]} : vector<16x128xf32> to vector<2x128xf32>
    %cst_17 = arith.constant dense<0.000000e+00> : vector<2x128xf32>
    %30 = tpu.matmul %27, %18, %cst_17 {dimension_numbers = #tpu.dot_dimension_numbers<[1], [0], [0], [1], [0, 0, 1, 1], [], []>} : vector<2x128xf32>, vector<128x128xf32>, vector<2x128xf32> -> vector<2x128xf32>
    %31 = arith.addf %29, %30 : vector<2x128xf32>
    %32 = arith.addf %31, %31 : vector<2x128xf32>
    %33 = arith.select %5, %32, %31 : vector<2x128xi1>, vector<2x128xf32>
    %34 = arith.negf %33 : vector<2x128xf32>
    %35 = math.exp %34 : vector<2x128xf32>
    %cst_18 = arith.constant 1.000000e+00 : f32
    %36 = vector.broadcast %cst_18 : f32 to vector<2x128xf32>
    %37 = arith.addf %36, %35 : vector<2x128xf32>
    %38 = arith.divf %36, %37 : vector<2x128xf32>
    %39 = arith.addf %38, %38 : vector<2x128xf32>
    %cst_19 = arith.constant 1.000000e+00 : f32
    %40 = vector.broadcast %cst_19 : f32 to vector<2x128xf32>
    %41 = arith.subf %39, %40 : vector<2x128xf32>
    %42 = arith.select %5, %41, %38 : vector<2x128xi1>, vector<2x128xf32>
    %c96_i32_20 = arith.constant 96 : i32
    %43 = tpu.dynamic_rotate %42 by %c96_i32_20 dim 1 : vector<2x128xf32>, i32 -> vector<2x128xf32>
    %c64_i32_21 = arith.constant 64 : i32
    %44 = tpu.dynamic_rotate %42 by %c64_i32_21 dim 1 : vector<2x128xf32>, i32 -> vector<2x128xf32>
    %c32_i32 = arith.constant 32 : i32
    %45 = tpu.dynamic_rotate %42 by %c32_i32 dim 1 : vector<2x128xf32>, i32 -> vector<2x128xf32>
    %46 = arith.mulf %43, %28 : vector<2x128xf32>
    %47 = arith.mulf %42, %44 : vector<2x128xf32>
    %48 = arith.addf %46, %47 : vector<2x128xf32>
    %49 = math.tanh %48 : vector<2x128xf32>
    %50 = arith.mulf %45, %49 : vector<2x128xf32>
    %51 = vector.extract_strided_slice %26 {offsets = [2, 0], sizes = [2, 128], strides = [1, 1]} : vector<16x128xf32> to vector<2x128xf32>
    %cst_22 = arith.constant dense<0.000000e+00> : vector<2x128xf32>
    %52 = tpu.matmul %50, %18, %cst_22 {dimension_numbers = #tpu.dot_dimension_numbers<[1], [0], [0], [1], [0, 0, 1, 1], [], []>} : vector<2x128xf32>, vector<128x128xf32>, vector<2x128xf32> -> vector<2x128xf32>
    %53 = arith.addf %51, %52 : vector<2x128xf32>
    %54 = arith.addf %53, %53 : vector<2x128xf32>
    %55 = arith.select %5, %54, %53 : vector<2x128xi1>, vector<2x128xf32>
    %56 = arith.negf %55 : vector<2x128xf32>
    %57 = math.exp %56 : vector<2x128xf32>
    %cst_23 = arith.constant 1.000000e+00 : f32
    %58 = vector.broadcast %cst_23 : f32 to vector<2x128xf32>
    %59 = arith.addf %58, %57 : vector<2x128xf32>
    %60 = arith.divf %58, %59 : vector<2x128xf32>
    %61 = arith.addf %60, %60 : vector<2x128xf32>
    %cst_24 = arith.constant 1.000000e+00 : f32
    %62 = vector.broadcast %cst_24 : f32 to vector<2x128xf32>
    %63 = arith.subf %61, %62 : vector<2x128xf32>
    %64 = arith.select %5, %63, %60 : vector<2x128xi1>, vector<2x128xf32>
    %c96_i32_25 = arith.constant 96 : i32
    %65 = tpu.dynamic_rotate %64 by %c96_i32_25 dim 1 : vector<2x128xf32>, i32 -> vector<2x128xf32>
    %c64_i32_26 = arith.constant 64 : i32
    %66 = tpu.dynamic_rotate %64 by %c64_i32_26 dim 1 : vector<2x128xf32>, i32 -> vector<2x128xf32>
    %c32_i32_27 = arith.constant 32 : i32
    %67 = tpu.dynamic_rotate %64 by %c32_i32_27 dim 1 : vector<2x128xf32>, i32 -> vector<2x128xf32>
    %68 = arith.mulf %65, %48 : vector<2x128xf32>
    %69 = arith.mulf %64, %66 : vector<2x128xf32>
    %70 = arith.addf %68, %69 : vector<2x128xf32>
    %71 = math.tanh %70 : vector<2x128xf32>
    %72 = arith.mulf %67, %71 : vector<2x128xf32>
    %73 = vector.extract_strided_slice %26 {offsets = [4, 0], sizes = [2, 128], strides = [1, 1]} : vector<16x128xf32> to vector<2x128xf32>
    %cst_28 = arith.constant dense<0.000000e+00> : vector<2x128xf32>
    %74 = tpu.matmul %72, %18, %cst_28 {dimension_numbers = #tpu.dot_dimension_numbers<[1], [0], [0], [1], [0, 0, 1, 1], [], []>} : vector<2x128xf32>, vector<128x128xf32>, vector<2x128xf32> -> vector<2x128xf32>
    %75 = arith.addf %73, %74 : vector<2x128xf32>
    %76 = arith.addf %75, %75 : vector<2x128xf32>
    %77 = arith.select %5, %76, %75 : vector<2x128xi1>, vector<2x128xf32>
    %78 = arith.negf %77 : vector<2x128xf32>
    %79 = math.exp %78 : vector<2x128xf32>
    %cst_29 = arith.constant 1.000000e+00 : f32
    %80 = vector.broadcast %cst_29 : f32 to vector<2x128xf32>
    %81 = arith.addf %80, %79 : vector<2x128xf32>
    %82 = arith.divf %80, %81 : vector<2x128xf32>
    %83 = arith.addf %82, %82 : vector<2x128xf32>
    %cst_30 = arith.constant 1.000000e+00 : f32
    %84 = vector.broadcast %cst_30 : f32 to vector<2x128xf32>
    %85 = arith.subf %83, %84 : vector<2x128xf32>
    %86 = arith.select %5, %85, %82 : vector<2x128xi1>, vector<2x128xf32>
    %c96_i32_31 = arith.constant 96 : i32
    %87 = tpu.dynamic_rotate %86 by %c96_i32_31 dim 1 : vector<2x128xf32>, i32 -> vector<2x128xf32>
    %c64_i32_32 = arith.constant 64 : i32
    %88 = tpu.dynamic_rotate %86 by %c64_i32_32 dim 1 : vector<2x128xf32>, i32 -> vector<2x128xf32>
    %c32_i32_33 = arith.constant 32 : i32
    %89 = tpu.dynamic_rotate %86 by %c32_i32_33 dim 1 : vector<2x128xf32>, i32 -> vector<2x128xf32>
    %90 = arith.mulf %87, %70 : vector<2x128xf32>
    %91 = arith.mulf %86, %88 : vector<2x128xf32>
    %92 = arith.addf %90, %91 : vector<2x128xf32>
    %93 = math.tanh %92 : vector<2x128xf32>
    %94 = arith.mulf %89, %93 : vector<2x128xf32>
    %95 = vector.extract_strided_slice %26 {offsets = [6, 0], sizes = [2, 128], strides = [1, 1]} : vector<16x128xf32> to vector<2x128xf32>
    %cst_34 = arith.constant dense<0.000000e+00> : vector<2x128xf32>
    %96 = tpu.matmul %94, %18, %cst_34 {dimension_numbers = #tpu.dot_dimension_numbers<[1], [0], [0], [1], [0, 0, 1, 1], [], []>} : vector<2x128xf32>, vector<128x128xf32>, vector<2x128xf32> -> vector<2x128xf32>
    %97 = arith.addf %95, %96 : vector<2x128xf32>
    %98 = arith.addf %97, %97 : vector<2x128xf32>
    %99 = arith.select %5, %98, %97 : vector<2x128xi1>, vector<2x128xf32>
    %100 = arith.negf %99 : vector<2x128xf32>
    %101 = math.exp %100 : vector<2x128xf32>
    %cst_35 = arith.constant 1.000000e+00 : f32
    %102 = vector.broadcast %cst_35 : f32 to vector<2x128xf32>
    %103 = arith.addf %102, %101 : vector<2x128xf32>
    %104 = arith.divf %102, %103 : vector<2x128xf32>
    %105 = arith.addf %104, %104 : vector<2x128xf32>
    %cst_36 = arith.constant 1.000000e+00 : f32
    %106 = vector.broadcast %cst_36 : f32 to vector<2x128xf32>
    %107 = arith.subf %105, %106 : vector<2x128xf32>
    %108 = arith.select %5, %107, %104 : vector<2x128xi1>, vector<2x128xf32>
    %c96_i32_37 = arith.constant 96 : i32
    %109 = tpu.dynamic_rotate %108 by %c96_i32_37 dim 1 : vector<2x128xf32>, i32 -> vector<2x128xf32>
    %c64_i32_38 = arith.constant 64 : i32
    %110 = tpu.dynamic_rotate %108 by %c64_i32_38 dim 1 : vector<2x128xf32>, i32 -> vector<2x128xf32>
    %c32_i32_39 = arith.constant 32 : i32
    %111 = tpu.dynamic_rotate %108 by %c32_i32_39 dim 1 : vector<2x128xf32>, i32 -> vector<2x128xf32>
    %112 = arith.mulf %109, %92 : vector<2x128xf32>
    %113 = arith.mulf %108, %110 : vector<2x128xf32>
    %114 = arith.addf %112, %113 : vector<2x128xf32>
    %115 = math.tanh %114 : vector<2x128xf32>
    %116 = arith.mulf %111, %115 : vector<2x128xf32>
    %117 = vector.extract_strided_slice %26 {offsets = [8, 0], sizes = [2, 128], strides = [1, 1]} : vector<16x128xf32> to vector<2x128xf32>
    %cst_40 = arith.constant dense<0.000000e+00> : vector<2x128xf32>
    %118 = tpu.matmul %116, %18, %cst_40 {dimension_numbers = #tpu.dot_dimension_numbers<[1], [0], [0], [1], [0, 0, 1, 1], [], []>} : vector<2x128xf32>, vector<128x128xf32>, vector<2x128xf32> -> vector<2x128xf32>
    %119 = arith.addf %117, %118 : vector<2x128xf32>
    %120 = arith.addf %119, %119 : vector<2x128xf32>
    %121 = arith.select %5, %120, %119 : vector<2x128xi1>, vector<2x128xf32>
    %122 = arith.negf %121 : vector<2x128xf32>
    %123 = math.exp %122 : vector<2x128xf32>
    %cst_41 = arith.constant 1.000000e+00 : f32
    %124 = vector.broadcast %cst_41 : f32 to vector<2x128xf32>
    %125 = arith.addf %124, %123 : vector<2x128xf32>
    %126 = arith.divf %124, %125 : vector<2x128xf32>
    %127 = arith.addf %126, %126 : vector<2x128xf32>
    %cst_42 = arith.constant 1.000000e+00 : f32
    %128 = vector.broadcast %cst_42 : f32 to vector<2x128xf32>
    %129 = arith.subf %127, %128 : vector<2x128xf32>
    %130 = arith.select %5, %129, %126 : vector<2x128xi1>, vector<2x128xf32>
    %c96_i32_43 = arith.constant 96 : i32
    %131 = tpu.dynamic_rotate %130 by %c96_i32_43 dim 1 : vector<2x128xf32>, i32 -> vector<2x128xf32>
    %c64_i32_44 = arith.constant 64 : i32
    %132 = tpu.dynamic_rotate %130 by %c64_i32_44 dim 1 : vector<2x128xf32>, i32 -> vector<2x128xf32>
    %c32_i32_45 = arith.constant 32 : i32
    %133 = tpu.dynamic_rotate %130 by %c32_i32_45 dim 1 : vector<2x128xf32>, i32 -> vector<2x128xf32>
    %134 = arith.mulf %131, %114 : vector<2x128xf32>
    %135 = arith.mulf %130, %132 : vector<2x128xf32>
    %136 = arith.addf %134, %135 : vector<2x128xf32>
    %137 = math.tanh %136 : vector<2x128xf32>
    %138 = arith.mulf %133, %137 : vector<2x128xf32>
    %139 = vector.extract_strided_slice %26 {offsets = [10, 0], sizes = [2, 128], strides = [1, 1]} : vector<16x128xf32> to vector<2x128xf32>
    %cst_46 = arith.constant dense<0.000000e+00> : vector<2x128xf32>
    %140 = tpu.matmul %138, %18, %cst_46 {dimension_numbers = #tpu.dot_dimension_numbers<[1], [0], [0], [1], [0, 0, 1, 1], [], []>} : vector<2x128xf32>, vector<128x128xf32>, vector<2x128xf32> -> vector<2x128xf32>
    %141 = arith.addf %139, %140 : vector<2x128xf32>
    %142 = arith.addf %141, %141 : vector<2x128xf32>
    %143 = arith.select %5, %142, %141 : vector<2x128xi1>, vector<2x128xf32>
    %144 = arith.negf %143 : vector<2x128xf32>
    %145 = math.exp %144 : vector<2x128xf32>
    %cst_47 = arith.constant 1.000000e+00 : f32
    %146 = vector.broadcast %cst_47 : f32 to vector<2x128xf32>
    %147 = arith.addf %146, %145 : vector<2x128xf32>
    %148 = arith.divf %146, %147 : vector<2x128xf32>
    %149 = arith.addf %148, %148 : vector<2x128xf32>
    %cst_48 = arith.constant 1.000000e+00 : f32
    %150 = vector.broadcast %cst_48 : f32 to vector<2x128xf32>
    %151 = arith.subf %149, %150 : vector<2x128xf32>
    %152 = arith.select %5, %151, %148 : vector<2x128xi1>, vector<2x128xf32>
    %c96_i32_49 = arith.constant 96 : i32
    %153 = tpu.dynamic_rotate %152 by %c96_i32_49 dim 1 : vector<2x128xf32>, i32 -> vector<2x128xf32>
    %c64_i32_50 = arith.constant 64 : i32
    %154 = tpu.dynamic_rotate %152 by %c64_i32_50 dim 1 : vector<2x128xf32>, i32 -> vector<2x128xf32>
    %c32_i32_51 = arith.constant 32 : i32
    %155 = tpu.dynamic_rotate %152 by %c32_i32_51 dim 1 : vector<2x128xf32>, i32 -> vector<2x128xf32>
    %156 = arith.mulf %153, %136 : vector<2x128xf32>
    %157 = arith.mulf %152, %154 : vector<2x128xf32>
    %158 = arith.addf %156, %157 : vector<2x128xf32>
    %159 = math.tanh %158 : vector<2x128xf32>
    %160 = arith.mulf %155, %159 : vector<2x128xf32>
    %161 = vector.extract_strided_slice %26 {offsets = [12, 0], sizes = [2, 128], strides = [1, 1]} : vector<16x128xf32> to vector<2x128xf32>
    %cst_52 = arith.constant dense<0.000000e+00> : vector<2x128xf32>
    %162 = tpu.matmul %160, %18, %cst_52 {dimension_numbers = #tpu.dot_dimension_numbers<[1], [0], [0], [1], [0, 0, 1, 1], [], []>} : vector<2x128xf32>, vector<128x128xf32>, vector<2x128xf32> -> vector<2x128xf32>
    %163 = arith.addf %161, %162 : vector<2x128xf32>
    %164 = arith.addf %163, %163 : vector<2x128xf32>
    %165 = arith.select %5, %164, %163 : vector<2x128xi1>, vector<2x128xf32>
    %166 = arith.negf %165 : vector<2x128xf32>
    %167 = math.exp %166 : vector<2x128xf32>
    %cst_53 = arith.constant 1.000000e+00 : f32
    %168 = vector.broadcast %cst_53 : f32 to vector<2x128xf32>
    %169 = arith.addf %168, %167 : vector<2x128xf32>
    %170 = arith.divf %168, %169 : vector<2x128xf32>
    %171 = arith.addf %170, %170 : vector<2x128xf32>
    %cst_54 = arith.constant 1.000000e+00 : f32
    %172 = vector.broadcast %cst_54 : f32 to vector<2x128xf32>
    %173 = arith.subf %171, %172 : vector<2x128xf32>
    %174 = arith.select %5, %173, %170 : vector<2x128xi1>, vector<2x128xf32>
    %c96_i32_55 = arith.constant 96 : i32
    %175 = tpu.dynamic_rotate %174 by %c96_i32_55 dim 1 : vector<2x128xf32>, i32 -> vector<2x128xf32>
    %c64_i32_56 = arith.constant 64 : i32
    %176 = tpu.dynamic_rotate %174 by %c64_i32_56 dim 1 : vector<2x128xf32>, i32 -> vector<2x128xf32>
    %c32_i32_57 = arith.constant 32 : i32
    %177 = tpu.dynamic_rotate %174 by %c32_i32_57 dim 1 : vector<2x128xf32>, i32 -> vector<2x128xf32>
    %178 = arith.mulf %175, %158 : vector<2x128xf32>
    %179 = arith.mulf %174, %176 : vector<2x128xf32>
    %180 = arith.addf %178, %179 : vector<2x128xf32>
    %181 = math.tanh %180 : vector<2x128xf32>
    %182 = arith.mulf %177, %181 : vector<2x128xf32>
    %183 = vector.extract_strided_slice %26 {offsets = [14, 0], sizes = [2, 128], strides = [1, 1]} : vector<16x128xf32> to vector<2x128xf32>
    %cst_58 = arith.constant dense<0.000000e+00> : vector<2x128xf32>
    %184 = tpu.matmul %182, %18, %cst_58 {dimension_numbers = #tpu.dot_dimension_numbers<[1], [0], [0], [1], [0, 0, 1, 1], [], []>} : vector<2x128xf32>, vector<128x128xf32>, vector<2x128xf32> -> vector<2x128xf32>
    %185 = arith.addf %183, %184 : vector<2x128xf32>
    %186 = arith.addf %185, %185 : vector<2x128xf32>
    %187 = arith.select %5, %186, %185 : vector<2x128xi1>, vector<2x128xf32>
    %188 = arith.negf %187 : vector<2x128xf32>
    %189 = math.exp %188 : vector<2x128xf32>
    %cst_59 = arith.constant 1.000000e+00 : f32
    %190 = vector.broadcast %cst_59 : f32 to vector<2x128xf32>
    %191 = arith.addf %190, %189 : vector<2x128xf32>
    %192 = arith.divf %190, %191 : vector<2x128xf32>
    %193 = arith.addf %192, %192 : vector<2x128xf32>
    %cst_60 = arith.constant 1.000000e+00 : f32
    %194 = vector.broadcast %cst_60 : f32 to vector<2x128xf32>
    %195 = arith.subf %193, %194 : vector<2x128xf32>
    %196 = arith.select %5, %195, %192 : vector<2x128xi1>, vector<2x128xf32>
    %c96_i32_61 = arith.constant 96 : i32
    %197 = tpu.dynamic_rotate %196 by %c96_i32_61 dim 1 : vector<2x128xf32>, i32 -> vector<2x128xf32>
    %c64_i32_62 = arith.constant 64 : i32
    %198 = tpu.dynamic_rotate %196 by %c64_i32_62 dim 1 : vector<2x128xf32>, i32 -> vector<2x128xf32>
    %c32_i32_63 = arith.constant 32 : i32
    %199 = tpu.dynamic_rotate %196 by %c32_i32_63 dim 1 : vector<2x128xf32>, i32 -> vector<2x128xf32>
    %200 = arith.mulf %197, %180 : vector<2x128xf32>
    %201 = arith.mulf %196, %198 : vector<2x128xf32>
    %202 = arith.addf %200, %201 : vector<2x128xf32>
    %203 = math.tanh %202 : vector<2x128xf32>
    %204 = arith.mulf %199, %203 : vector<2x128xf32>
    %cst_64 = arith.constant 0.000000e+00 : f32
    %205 = vector.broadcast %cst_64 : f32 to vector<2x128xf32>
    %c0_65 = arith.constant 0 : index
    %c0_66 = arith.constant 0 : index
    %c0_67 = arith.constant 0 : index
    %206 = vector.load %arg9[%c0_65, %c0_66, %c0_67] : memref<8x2x128xf32, #tpu.memory_space<vmem>>, vector<1x2x128xf32>
    %207 = vector.shape_cast %206 : vector<1x2x128xf32> to vector<2x128xf32>
    %208 = vector.shape_cast %205 : vector<2x128xf32> to vector<1x2x128xf32>
    tpu.vector_store %arg9[%c0_65, %c0_66, %c0_67], %208 {strides = array<i32>} : memref<8x2x128xf32, #tpu.memory_space<vmem>>, vector<1x2x128xf32>,
    %cst_68 = arith.constant dense<0.000000e+00> : vector<2x256xf32>
    %209 = tpu.matmul %204, %19, %cst_68 {dimension_numbers = #tpu.dot_dimension_numbers<[1], [0], [0], [1], [0, 0, 1, 1], [], []>} : vector<2x128xf32>, vector<128x256xf32>, vector<2x256xf32> -> vector<2x256xf32>
    %210 = arith.subf %11, %14 : vector<2x128xf32>
    %211 = vector.extract_strided_slice %209 {offsets = [0, 0], sizes = [2, 128], strides = [1, 1]} : vector<2x256xf32> to vector<2x128xf32>
    %212 = arith.addf %210, %211 : vector<2x128xf32>
    %213 = arith.addf %212, %212 : vector<2x128xf32>
    %214 = arith.select %5, %213, %212 : vector<2x128xi1>, vector<2x128xf32>
    %215 = arith.negf %214 : vector<2x128xf32>
    %216 = math.exp %215 : vector<2x128xf32>
    %cst_69 = arith.constant 1.000000e+00 : f32
    %217 = vector.broadcast %cst_69 : f32 to vector<2x128xf32>
    %218 = arith.addf %217, %216 : vector<2x128xf32>
    %219 = arith.divf %217, %218 : vector<2x128xf32>
    %220 = arith.addf %219, %219 : vector<2x128xf32>
    %cst_70 = arith.constant 1.000000e+00 : f32
    %221 = vector.broadcast %cst_70 : f32 to vector<2x128xf32>
    %222 = arith.subf %220, %221 : vector<2x128xf32>
    %223 = arith.select %5, %222, %219 : vector<2x128xi1>, vector<2x128xf32>
    %c96_i32_71 = arith.constant 96 : i32
    %224 = tpu.dynamic_rotate %223 by %c96_i32_71 dim 1 : vector<2x128xf32>, i32 -> vector<2x128xf32>
    %c64_i32_72 = arith.constant 64 : i32
    %225 = tpu.dynamic_rotate %223 by %c64_i32_72 dim 1 : vector<2x128xf32>, i32 -> vector<2x128xf32>
    %c32_i32_73 = arith.constant 32 : i32
    %226 = tpu.dynamic_rotate %223 by %c32_i32_73 dim 1 : vector<2x128xf32>, i32 -> vector<2x128xf32>
    %227 = arith.mulf %224, %202 : vector<2x128xf32>
    %228 = arith.mulf %223, %225 : vector<2x128xf32>
    %229 = arith.addf %227, %228 : vector<2x128xf32>
    %230 = math.tanh %229 : vector<2x128xf32>
    %231 = arith.mulf %226, %230 : vector<2x128xf32>
    %cst_74 = arith.constant dense<0.000000e+00> : vector<2x256xf32>
    %232 = tpu.matmul %231, %19, %cst_74 {dimension_numbers = #tpu.dot_dimension_numbers<[1], [0], [0], [1], [0, 0, 1, 1], [], []>} : vector<2x128xf32>, vector<128x256xf32>, vector<2x256xf32> -> vector<2x256xf32>
    %233 = vector.extract_strided_slice %232 {offsets = [0, 128], sizes = [2, 128], strides = [1, 1]} : vector<2x256xf32> to vector<2x128xf32>
    %234 = arith.addf %233, %17 : vector<2x128xf32>
    %c1 = arith.constant 1 : index
    %c0_75 = arith.constant 0 : index
    %c0_76 = arith.constant 0 : index
    %235 = vector.load %arg9[%c1, %c0_75, %c0_76] : memref<8x2x128xf32, #tpu.memory_space<vmem>>, vector<1x2x128xf32>
    %236 = vector.shape_cast %235 : vector<1x2x128xf32> to vector<2x128xf32>
    %237 = vector.shape_cast %234 : vector<2x128xf32> to vector<1x2x128xf32>
    tpu.vector_store %arg9[%c1, %c0_75, %c0_76], %237 {strides = array<i32>} : memref<8x2x128xf32, #tpu.memory_space<vmem>>, vector<1x2x128xf32>,
    %238 = tpu.bitcast %234 : vector<2x128xf32> -> vector<2x128xi32>
    %c0_i32 = arith.constant 0 : i32
    %239 = vector.broadcast %c0_i32 : i32 to vector<2x128xi32>
    %240 = arith.cmpi sge, %238, %239 : vector<2x128xi32>
    %c2147483647_i32 = arith.constant 2147483647 : i32
    %241 = vector.broadcast %c2147483647_i32 : i32 to vector<2x128xi32>
    %242 = arith.andi %238, %241 : vector<2x128xi32>
    %c0_i32_77 = arith.constant 0 : i32
    %243 = vector.broadcast %c0_i32_77 : i32 to vector<2x128xi32>
    %244 = arith.subi %243, %242 : vector<2x128xi32>
    %245 = arith.select %240, %238, %244 : vector<2x128xi1>, vector<2x128xi32>
    %c7_i32 = arith.constant 7 : i32
    %246 = vector.broadcast %c7_i32 : i32 to vector<2x128xi32>
    %247 = arith.shrsi %245, %246 : vector<2x128xi32>
    %c7_i32_78 = arith.constant 7 : i32
    %248 = vector.broadcast %c7_i32_78 : i32 to vector<2x128xi32>
    %249 = arith.shli %247, %248 : vector<2x128xi32>
    %250 = arith.ori %249, %8 : vector<2x128xi32>
    %cst_79 = arith.constant dense<-2147483648> : vector<2xi32>
    %251 = vector.multi_reduction <maxsi>, %250, %cst_79 [1] : vector<2x128xi32> to vector<2xi32>
    %252 = vector.shape_cast %251 : vector<2xi32> to vector<2x1xi32>
    %c127_i32_80 = arith.constant 127 : i32
    %253 = vector.broadcast %c127_i32_80 : i32 to vector<2x1xi32>
    %254 = arith.andi %252, %253 : vector<2x1xi32>
    %c127_i32_81 = arith.constant 127 : i32
    %255 = vector.broadcast %c127_i32_81 : i32 to vector<2x1xi32>
    %256 = arith.subi %255, %254 : vector<2x1xi32>
    %257 = arith.sitofp %256 : vector<2x1xi32> to vector<2x1xf32>
    %258 = vector.broadcast %257 : vector<2x1xf32> to vector<2x128xf32>
    %259 = arith.mulf %258, %14 : vector<2x128xf32>
    %260 = arith.addf %259, %11 : vector<2x128xf32>
    %261 = vector.extract_strided_slice %232 {offsets = [0, 0], sizes = [2, 128], strides = [1, 1]} : vector<2x256xf32> to vector<2x128xf32>
    %262 = arith.addf %260, %261 : vector<2x128xf32>
    %263 = arith.addf %262, %262 : vector<2x128xf32>
    %264 = arith.select %5, %263, %262 : vector<2x128xi1>, vector<2x128xf32>
    %265 = arith.negf %264 : vector<2x128xf32>
    %266 = math.exp %265 : vector<2x128xf32>
    %cst_82 = arith.constant 1.000000e+00 : f32
    %267 = vector.broadcast %cst_82 : f32 to vector<2x128xf32>
    %268 = arith.addf %267, %266 : vector<2x128xf32>
    %269 = arith.divf %267, %268 : vector<2x128xf32>
    %270 = arith.addf %269, %269 : vector<2x128xf32>
    %cst_83 = arith.constant 1.000000e+00 : f32
    %271 = vector.broadcast %cst_83 : f32 to vector<2x128xf32>
    %272 = arith.subf %270, %271 : vector<2x128xf32>
    %273 = arith.select %5, %272, %269 : vector<2x128xi1>, vector<2x128xf32>
    %c96_i32_84 = arith.constant 96 : i32
    %274 = tpu.dynamic_rotate %273 by %c96_i32_84 dim 1 : vector<2x128xf32>, i32 -> vector<2x128xf32>
    %c64_i32_85 = arith.constant 64 : i32
    %275 = tpu.dynamic_rotate %273 by %c64_i32_85 dim 1 : vector<2x128xf32>, i32 -> vector<2x128xf32>
    %c32_i32_86 = arith.constant 32 : i32
    %276 = tpu.dynamic_rotate %273 by %c32_i32_86 dim 1 : vector<2x128xf32>, i32 -> vector<2x128xf32>
    %277 = arith.mulf %274, %229 : vector<2x128xf32>
    %278 = arith.mulf %273, %275 : vector<2x128xf32>
    %279 = arith.addf %277, %278 : vector<2x128xf32>
    %280 = math.tanh %279 : vector<2x128xf32>
    %281 = arith.mulf %276, %280 : vector<2x128xf32>
    %cst_87 = arith.constant dense<0.000000e+00> : vector<2x256xf32>
    %282 = tpu.matmul %281, %19, %cst_87 {dimension_numbers = #tpu.dot_dimension_numbers<[1], [0], [0], [1], [0, 0, 1, 1], [], []>} : vector<2x128xf32>, vector<128x256xf32>, vector<2x256xf32> -> vector<2x256xf32>
    %283 = vector.extract_strided_slice %282 {offsets = [0, 128], sizes = [2, 128], strides = [1, 1]} : vector<2x256xf32> to vector<2x128xf32>
    %284 = arith.addf %283, %17 : vector<2x128xf32>
    %c2 = arith.constant 2 : index
    %c0_88 = arith.constant 0 : index
    %c0_89 = arith.constant 0 : index
    %285 = vector.load %arg9[%c2, %c0_88, %c0_89] : memref<8x2x128xf32, #tpu.memory_space<vmem>>, vector<1x2x128xf32>
    %286 = vector.shape_cast %285 : vector<1x2x128xf32> to vector<2x128xf32>
    %287 = vector.shape_cast %284 : vector<2x128xf32> to vector<1x2x128xf32>
    tpu.vector_store %arg9[%c2, %c0_88, %c0_89], %287 {strides = array<i32>} : memref<8x2x128xf32, #tpu.memory_space<vmem>>, vector<1x2x128xf32>,
    %288 = tpu.bitcast %284 : vector<2x128xf32> -> vector<2x128xi32>
    %c0_i32_90 = arith.constant 0 : i32
    %289 = vector.broadcast %c0_i32_90 : i32 to vector<2x128xi32>
    %290 = arith.cmpi sge, %288, %289 : vector<2x128xi32>
    %c2147483647_i32_91 = arith.constant 2147483647 : i32
    %291 = vector.broadcast %c2147483647_i32_91 : i32 to vector<2x128xi32>
    %292 = arith.andi %288, %291 : vector<2x128xi32>
    %c0_i32_92 = arith.constant 0 : i32
    %293 = vector.broadcast %c0_i32_92 : i32 to vector<2x128xi32>
    %294 = arith.subi %293, %292 : vector<2x128xi32>
    %295 = arith.select %290, %288, %294 : vector<2x128xi1>, vector<2x128xi32>
    %c7_i32_93 = arith.constant 7 : i32
    %296 = vector.broadcast %c7_i32_93 : i32 to vector<2x128xi32>
    %297 = arith.shrsi %295, %296 : vector<2x128xi32>
    %c7_i32_94 = arith.constant 7 : i32
    %298 = vector.broadcast %c7_i32_94 : i32 to vector<2x128xi32>
    %299 = arith.shli %297, %298 : vector<2x128xi32>
    %300 = arith.ori %299, %8 : vector<2x128xi32>
    %cst_95 = arith.constant dense<-2147483648> : vector<2xi32>
    %301 = vector.multi_reduction <maxsi>, %300, %cst_95 [1] : vector<2x128xi32> to vector<2xi32>
    %302 = vector.shape_cast %301 : vector<2xi32> to vector<2x1xi32>
    %c127_i32_96 = arith.constant 127 : i32
    %303 = vector.broadcast %c127_i32_96 : i32 to vector<2x1xi32>
    %304 = arith.andi %302, %303 : vector<2x1xi32>
    %c127_i32_97 = arith.constant 127 : i32
    %305 = vector.broadcast %c127_i32_97 : i32 to vector<2x1xi32>
    %306 = arith.subi %305, %304 : vector<2x1xi32>
    %307 = arith.sitofp %306 : vector<2x1xi32> to vector<2x1xf32>
    %308 = vector.broadcast %307 : vector<2x1xf32> to vector<2x128xf32>
    %309 = arith.mulf %308, %14 : vector<2x128xf32>
    %310 = arith.addf %309, %11 : vector<2x128xf32>
    %311 = vector.extract_strided_slice %282 {offsets = [0, 0], sizes = [2, 128], strides = [1, 1]} : vector<2x256xf32> to vector<2x128xf32>
    %312 = arith.addf %310, %311 : vector<2x128xf32>
    %313 = arith.addf %312, %312 : vector<2x128xf32>
    %314 = arith.select %5, %313, %312 : vector<2x128xi1>, vector<2x128xf32>
    %315 = arith.negf %314 : vector<2x128xf32>
    %316 = math.exp %315 : vector<2x128xf32>
    %cst_98 = arith.constant 1.000000e+00 : f32
    %317 = vector.broadcast %cst_98 : f32 to vector<2x128xf32>
    %318 = arith.addf %317, %316 : vector<2x128xf32>
    %319 = arith.divf %317, %318 : vector<2x128xf32>
    %320 = arith.addf %319, %319 : vector<2x128xf32>
    %cst_99 = arith.constant 1.000000e+00 : f32
    %321 = vector.broadcast %cst_99 : f32 to vector<2x128xf32>
    %322 = arith.subf %320, %321 : vector<2x128xf32>
    %323 = arith.select %5, %322, %319 : vector<2x128xi1>, vector<2x128xf32>
    %c96_i32_100 = arith.constant 96 : i32
    %324 = tpu.dynamic_rotate %323 by %c96_i32_100 dim 1 : vector<2x128xf32>, i32 -> vector<2x128xf32>
    %c64_i32_101 = arith.constant 64 : i32
    %325 = tpu.dynamic_rotate %323 by %c64_i32_101 dim 1 : vector<2x128xf32>, i32 -> vector<2x128xf32>
    %c32_i32_102 = arith.constant 32 : i32
    %326 = tpu.dynamic_rotate %323 by %c32_i32_102 dim 1 : vector<2x128xf32>, i32 -> vector<2x128xf32>
    %327 = arith.mulf %324, %279 : vector<2x128xf32>
    %328 = arith.mulf %323, %325 : vector<2x128xf32>
    %329 = arith.addf %327, %328 : vector<2x128xf32>
    %330 = math.tanh %329 : vector<2x128xf32>
    %331 = arith.mulf %326, %330 : vector<2x128xf32>
    %cst_103 = arith.constant dense<0.000000e+00> : vector<2x256xf32>
    %332 = tpu.matmul %331, %19, %cst_103 {dimension_numbers = #tpu.dot_dimension_numbers<[1], [0], [0], [1], [0, 0, 1, 1], [], []>} : vector<2x128xf32>, vector<128x256xf32>, vector<2x256xf32> -> vector<2x256xf32>
    %333 = vector.extract_strided_slice %332 {offsets = [0, 128], sizes = [2, 128], strides = [1, 1]} : vector<2x256xf32> to vector<2x128xf32>
    %334 = arith.addf %333, %17 : vector<2x128xf32>
    %c3 = arith.constant 3 : index
    %c0_104 = arith.constant 0 : index
    %c0_105 = arith.constant 0 : index
    %335 = vector.load %arg9[%c3, %c0_104, %c0_105] : memref<8x2x128xf32, #tpu.memory_space<vmem>>, vector<1x2x128xf32>
    %336 = vector.shape_cast %335 : vector<1x2x128xf32> to vector<2x128xf32>
    %337 = vector.shape_cast %334 : vector<2x128xf32> to vector<1x2x128xf32>
    tpu.vector_store %arg9[%c3, %c0_104, %c0_105], %337 {strides = array<i32>} : memref<8x2x128xf32, #tpu.memory_space<vmem>>, vector<1x2x128xf32>,
    %338 = tpu.bitcast %334 : vector<2x128xf32> -> vector<2x128xi32>
    %c0_i32_106 = arith.constant 0 : i32
    %339 = vector.broadcast %c0_i32_106 : i32 to vector<2x128xi32>
    %340 = arith.cmpi sge, %338, %339 : vector<2x128xi32>
    %c2147483647_i32_107 = arith.constant 2147483647 : i32
    %341 = vector.broadcast %c2147483647_i32_107 : i32 to vector<2x128xi32>
    %342 = arith.andi %338, %341 : vector<2x128xi32>
    %c0_i32_108 = arith.constant 0 : i32
    %343 = vector.broadcast %c0_i32_108 : i32 to vector<2x128xi32>
    %344 = arith.subi %343, %342 : vector<2x128xi32>
    %345 = arith.select %340, %338, %344 : vector<2x128xi1>, vector<2x128xi32>
    %c7_i32_109 = arith.constant 7 : i32
    %346 = vector.broadcast %c7_i32_109 : i32 to vector<2x128xi32>
    %347 = arith.shrsi %345, %346 : vector<2x128xi32>
    %c7_i32_110 = arith.constant 7 : i32
    %348 = vector.broadcast %c7_i32_110 : i32 to vector<2x128xi32>
    %349 = arith.shli %347, %348 : vector<2x128xi32>
    %350 = arith.ori %349, %8 : vector<2x128xi32>
    %cst_111 = arith.constant dense<-2147483648> : vector<2xi32>
    %351 = vector.multi_reduction <maxsi>, %350, %cst_111 [1] : vector<2x128xi32> to vector<2xi32>
    %352 = vector.shape_cast %351 : vector<2xi32> to vector<2x1xi32>
    %c127_i32_112 = arith.constant 127 : i32
    %353 = vector.broadcast %c127_i32_112 : i32 to vector<2x1xi32>
    %354 = arith.andi %352, %353 : vector<2x1xi32>
    %c127_i32_113 = arith.constant 127 : i32
    %355 = vector.broadcast %c127_i32_113 : i32 to vector<2x1xi32>
    %356 = arith.subi %355, %354 : vector<2x1xi32>
    %357 = arith.sitofp %356 : vector<2x1xi32> to vector<2x1xf32>
    %358 = vector.broadcast %357 : vector<2x1xf32> to vector<2x128xf32>
    %359 = arith.mulf %358, %14 : vector<2x128xf32>
    %360 = arith.addf %359, %11 : vector<2x128xf32>
    %361 = vector.extract_strided_slice %332 {offsets = [0, 0], sizes = [2, 128], strides = [1, 1]} : vector<2x256xf32> to vector<2x128xf32>
    %362 = arith.addf %360, %361 : vector<2x128xf32>
    %363 = arith.addf %362, %362 : vector<2x128xf32>
    %364 = arith.select %5, %363, %362 : vector<2x128xi1>, vector<2x128xf32>
    %365 = arith.negf %364 : vector<2x128xf32>
    %366 = math.exp %365 : vector<2x128xf32>
    %cst_114 = arith.constant 1.000000e+00 : f32
    %367 = vector.broadcast %cst_114 : f32 to vector<2x128xf32>
    %368 = arith.addf %367, %366 : vector<2x128xf32>
    %369 = arith.divf %367, %368 : vector<2x128xf32>
    %370 = arith.addf %369, %369 : vector<2x128xf32>
    %cst_115 = arith.constant 1.000000e+00 : f32
    %371 = vector.broadcast %cst_115 : f32 to vector<2x128xf32>
    %372 = arith.subf %370, %371 : vector<2x128xf32>
    %373 = arith.select %5, %372, %369 : vector<2x128xi1>, vector<2x128xf32>
    %c96_i32_116 = arith.constant 96 : i32
    %374 = tpu.dynamic_rotate %373 by %c96_i32_116 dim 1 : vector<2x128xf32>, i32 -> vector<2x128xf32>
    %c64_i32_117 = arith.constant 64 : i32
    %375 = tpu.dynamic_rotate %373 by %c64_i32_117 dim 1 : vector<2x128xf32>, i32 -> vector<2x128xf32>
    %c32_i32_118 = arith.constant 32 : i32
    %376 = tpu.dynamic_rotate %373 by %c32_i32_118 dim 1 : vector<2x128xf32>, i32 -> vector<2x128xf32>
    %377 = arith.mulf %374, %329 : vector<2x128xf32>
    %378 = arith.mulf %373, %375 : vector<2x128xf32>
    %379 = arith.addf %377, %378 : vector<2x128xf32>
    %380 = math.tanh %379 : vector<2x128xf32>
    %381 = arith.mulf %376, %380 : vector<2x128xf32>
    %cst_119 = arith.constant dense<0.000000e+00> : vector<2x256xf32>
    %382 = tpu.matmul %381, %19, %cst_119 {dimension_numbers = #tpu.dot_dimension_numbers<[1], [0], [0], [1], [0, 0, 1, 1], [], []>} : vector<2x128xf32>, vector<128x256xf32>, vector<2x256xf32> -> vector<2x256xf32>
    %383 = vector.extract_strided_slice %382 {offsets = [0, 128], sizes = [2, 128], strides = [1, 1]} : vector<2x256xf32> to vector<2x128xf32>
    %384 = arith.addf %383, %17 : vector<2x128xf32>
    %c4 = arith.constant 4 : index
    %c0_120 = arith.constant 0 : index
    %c0_121 = arith.constant 0 : index
    %385 = vector.load %arg9[%c4, %c0_120, %c0_121] : memref<8x2x128xf32, #tpu.memory_space<vmem>>, vector<1x2x128xf32>
    %386 = vector.shape_cast %385 : vector<1x2x128xf32> to vector<2x128xf32>
    %387 = vector.shape_cast %384 : vector<2x128xf32> to vector<1x2x128xf32>
    tpu.vector_store %arg9[%c4, %c0_120, %c0_121], %387 {strides = array<i32>} : memref<8x2x128xf32, #tpu.memory_space<vmem>>, vector<1x2x128xf32>,
    %388 = tpu.bitcast %384 : vector<2x128xf32> -> vector<2x128xi32>
    %c0_i32_122 = arith.constant 0 : i32
    %389 = vector.broadcast %c0_i32_122 : i32 to vector<2x128xi32>
    %390 = arith.cmpi sge, %388, %389 : vector<2x128xi32>
    %c2147483647_i32_123 = arith.constant 2147483647 : i32
    %391 = vector.broadcast %c2147483647_i32_123 : i32 to vector<2x128xi32>
    %392 = arith.andi %388, %391 : vector<2x128xi32>
    %c0_i32_124 = arith.constant 0 : i32
    %393 = vector.broadcast %c0_i32_124 : i32 to vector<2x128xi32>
    %394 = arith.subi %393, %392 : vector<2x128xi32>
    %395 = arith.select %390, %388, %394 : vector<2x128xi1>, vector<2x128xi32>
    %c7_i32_125 = arith.constant 7 : i32
    %396 = vector.broadcast %c7_i32_125 : i32 to vector<2x128xi32>
    %397 = arith.shrsi %395, %396 : vector<2x128xi32>
    %c7_i32_126 = arith.constant 7 : i32
    %398 = vector.broadcast %c7_i32_126 : i32 to vector<2x128xi32>
    %399 = arith.shli %397, %398 : vector<2x128xi32>
    %400 = arith.ori %399, %8 : vector<2x128xi32>
    %cst_127 = arith.constant dense<-2147483648> : vector<2xi32>
    %401 = vector.multi_reduction <maxsi>, %400, %cst_127 [1] : vector<2x128xi32> to vector<2xi32>
    %402 = vector.shape_cast %401 : vector<2xi32> to vector<2x1xi32>
    %c127_i32_128 = arith.constant 127 : i32
    %403 = vector.broadcast %c127_i32_128 : i32 to vector<2x1xi32>
    %404 = arith.andi %402, %403 : vector<2x1xi32>
    %c127_i32_129 = arith.constant 127 : i32
    %405 = vector.broadcast %c127_i32_129 : i32 to vector<2x1xi32>
    %406 = arith.subi %405, %404 : vector<2x1xi32>
    %407 = arith.sitofp %406 : vector<2x1xi32> to vector<2x1xf32>
    %408 = vector.broadcast %407 : vector<2x1xf32> to vector<2x128xf32>
    %409 = arith.mulf %408, %14 : vector<2x128xf32>
    %410 = arith.addf %409, %11 : vector<2x128xf32>
    %411 = vector.extract_strided_slice %382 {offsets = [0, 0], sizes = [2, 128], strides = [1, 1]} : vector<2x256xf32> to vector<2x128xf32>
    %412 = arith.addf %410, %411 : vector<2x128xf32>
    %413 = arith.addf %412, %412 : vector<2x128xf32>
    %414 = arith.select %5, %413, %412 : vector<2x128xi1>, vector<2x128xf32>
    %415 = arith.negf %414 : vector<2x128xf32>
    %416 = math.exp %415 : vector<2x128xf32>
    %cst_130 = arith.constant 1.000000e+00 : f32
    %417 = vector.broadcast %cst_130 : f32 to vector<2x128xf32>
    %418 = arith.addf %417, %416 : vector<2x128xf32>
    %419 = arith.divf %417, %418 : vector<2x128xf32>
    %420 = arith.addf %419, %419 : vector<2x128xf32>
    %cst_131 = arith.constant 1.000000e+00 : f32
    %421 = vector.broadcast %cst_131 : f32 to vector<2x128xf32>
    %422 = arith.subf %420, %421 : vector<2x128xf32>
    %423 = arith.select %5, %422, %419 : vector<2x128xi1>, vector<2x128xf32>
    %c96_i32_132 = arith.constant 96 : i32
    %424 = tpu.dynamic_rotate %423 by %c96_i32_132 dim 1 : vector<2x128xf32>, i32 -> vector<2x128xf32>
    %c64_i32_133 = arith.constant 64 : i32
    %425 = tpu.dynamic_rotate %423 by %c64_i32_133 dim 1 : vector<2x128xf32>, i32 -> vector<2x128xf32>
    %c32_i32_134 = arith.constant 32 : i32
    %426 = tpu.dynamic_rotate %423 by %c32_i32_134 dim 1 : vector<2x128xf32>, i32 -> vector<2x128xf32>
    %427 = arith.mulf %424, %379 : vector<2x128xf32>
    %428 = arith.mulf %423, %425 : vector<2x128xf32>
    %429 = arith.addf %427, %428 : vector<2x128xf32>
    %430 = math.tanh %429 : vector<2x128xf32>
    %431 = arith.mulf %426, %430 : vector<2x128xf32>
    %cst_135 = arith.constant dense<0.000000e+00> : vector<2x256xf32>
    %432 = tpu.matmul %431, %19, %cst_135 {dimension_numbers = #tpu.dot_dimension_numbers<[1], [0], [0], [1], [0, 0, 1, 1], [], []>} : vector<2x128xf32>, vector<128x256xf32>, vector<2x256xf32> -> vector<2x256xf32>
    %433 = vector.extract_strided_slice %432 {offsets = [0, 128], sizes = [2, 128], strides = [1, 1]} : vector<2x256xf32> to vector<2x128xf32>
    %434 = arith.addf %433, %17 : vector<2x128xf32>
    %c5 = arith.constant 5 : index
    %c0_136 = arith.constant 0 : index
    %c0_137 = arith.constant 0 : index
    %435 = vector.load %arg9[%c5, %c0_136, %c0_137] : memref<8x2x128xf32, #tpu.memory_space<vmem>>, vector<1x2x128xf32>
    %436 = vector.shape_cast %435 : vector<1x2x128xf32> to vector<2x128xf32>
    %437 = vector.shape_cast %434 : vector<2x128xf32> to vector<1x2x128xf32>
    tpu.vector_store %arg9[%c5, %c0_136, %c0_137], %437 {strides = array<i32>} : memref<8x2x128xf32, #tpu.memory_space<vmem>>, vector<1x2x128xf32>,
    %438 = tpu.bitcast %434 : vector<2x128xf32> -> vector<2x128xi32>
    %c0_i32_138 = arith.constant 0 : i32
    %439 = vector.broadcast %c0_i32_138 : i32 to vector<2x128xi32>
    %440 = arith.cmpi sge, %438, %439 : vector<2x128xi32>
    %c2147483647_i32_139 = arith.constant 2147483647 : i32
    %441 = vector.broadcast %c2147483647_i32_139 : i32 to vector<2x128xi32>
    %442 = arith.andi %438, %441 : vector<2x128xi32>
    %c0_i32_140 = arith.constant 0 : i32
    %443 = vector.broadcast %c0_i32_140 : i32 to vector<2x128xi32>
    %444 = arith.subi %443, %442 : vector<2x128xi32>
    %445 = arith.select %440, %438, %444 : vector<2x128xi1>, vector<2x128xi32>
    %c7_i32_141 = arith.constant 7 : i32
    %446 = vector.broadcast %c7_i32_141 : i32 to vector<2x128xi32>
    %447 = arith.shrsi %445, %446 : vector<2x128xi32>
    %c7_i32_142 = arith.constant 7 : i32
    %448 = vector.broadcast %c7_i32_142 : i32 to vector<2x128xi32>
    %449 = arith.shli %447, %448 : vector<2x128xi32>
    %450 = arith.ori %449, %8 : vector<2x128xi32>
    %cst_143 = arith.constant dense<-2147483648> : vector<2xi32>
    %451 = vector.multi_reduction <maxsi>, %450, %cst_143 [1] : vector<2x128xi32> to vector<2xi32>
    %452 = vector.shape_cast %451 : vector<2xi32> to vector<2x1xi32>
    %c127_i32_144 = arith.constant 127 : i32
    %453 = vector.broadcast %c127_i32_144 : i32 to vector<2x1xi32>
    %454 = arith.andi %452, %453 : vector<2x1xi32>
    %c127_i32_145 = arith.constant 127 : i32
    %455 = vector.broadcast %c127_i32_145 : i32 to vector<2x1xi32>
    %456 = arith.subi %455, %454 : vector<2x1xi32>
    %457 = arith.sitofp %456 : vector<2x1xi32> to vector<2x1xf32>
    %458 = vector.broadcast %457 : vector<2x1xf32> to vector<2x128xf32>
    %459 = arith.mulf %458, %14 : vector<2x128xf32>
    %460 = arith.addf %459, %11 : vector<2x128xf32>
    %461 = vector.extract_strided_slice %432 {offsets = [0, 0], sizes = [2, 128], strides = [1, 1]} : vector<2x256xf32> to vector<2x128xf32>
    %462 = arith.addf %460, %461 : vector<2x128xf32>
    %463 = arith.addf %462, %462 : vector<2x128xf32>
    %464 = arith.select %5, %463, %462 : vector<2x128xi1>, vector<2x128xf32>
    %465 = arith.negf %464 : vector<2x128xf32>
    %466 = math.exp %465 : vector<2x128xf32>
    %cst_146 = arith.constant 1.000000e+00 : f32
    %467 = vector.broadcast %cst_146 : f32 to vector<2x128xf32>
    %468 = arith.addf %467, %466 : vector<2x128xf32>
    %469 = arith.divf %467, %468 : vector<2x128xf32>
    %470 = arith.addf %469, %469 : vector<2x128xf32>
    %cst_147 = arith.constant 1.000000e+00 : f32
    %471 = vector.broadcast %cst_147 : f32 to vector<2x128xf32>
    %472 = arith.subf %470, %471 : vector<2x128xf32>
    %473 = arith.select %5, %472, %469 : vector<2x128xi1>, vector<2x128xf32>
    %c96_i32_148 = arith.constant 96 : i32
    %474 = tpu.dynamic_rotate %473 by %c96_i32_148 dim 1 : vector<2x128xf32>, i32 -> vector<2x128xf32>
    %c64_i32_149 = arith.constant 64 : i32
    %475 = tpu.dynamic_rotate %473 by %c64_i32_149 dim 1 : vector<2x128xf32>, i32 -> vector<2x128xf32>
    %c32_i32_150 = arith.constant 32 : i32
    %476 = tpu.dynamic_rotate %473 by %c32_i32_150 dim 1 : vector<2x128xf32>, i32 -> vector<2x128xf32>
    %477 = arith.mulf %474, %429 : vector<2x128xf32>
    %478 = arith.mulf %473, %475 : vector<2x128xf32>
    %479 = arith.addf %477, %478 : vector<2x128xf32>
    %480 = math.tanh %479 : vector<2x128xf32>
    %481 = arith.mulf %476, %480 : vector<2x128xf32>
    %cst_151 = arith.constant dense<0.000000e+00> : vector<2x256xf32>
    %482 = tpu.matmul %481, %19, %cst_151 {dimension_numbers = #tpu.dot_dimension_numbers<[1], [0], [0], [1], [0, 0, 1, 1], [], []>} : vector<2x128xf32>, vector<128x256xf32>, vector<2x256xf32> -> vector<2x256xf32>
    %483 = vector.extract_strided_slice %482 {offsets = [0, 128], sizes = [2, 128], strides = [1, 1]} : vector<2x256xf32> to vector<2x128xf32>
    %484 = arith.addf %483, %17 : vector<2x128xf32>
    %c6 = arith.constant 6 : index
    %c0_152 = arith.constant 0 : index
    %c0_153 = arith.constant 0 : index
    %485 = vector.load %arg9[%c6, %c0_152, %c0_153] : memref<8x2x128xf32, #tpu.memory_space<vmem>>, vector<1x2x128xf32>
    %486 = vector.shape_cast %485 : vector<1x2x128xf32> to vector<2x128xf32>
    %487 = vector.shape_cast %484 : vector<2x128xf32> to vector<1x2x128xf32>
    tpu.vector_store %arg9[%c6, %c0_152, %c0_153], %487 {strides = array<i32>} : memref<8x2x128xf32, #tpu.memory_space<vmem>>, vector<1x2x128xf32>,
    %488 = tpu.bitcast %484 : vector<2x128xf32> -> vector<2x128xi32>
    %c0_i32_154 = arith.constant 0 : i32
    %489 = vector.broadcast %c0_i32_154 : i32 to vector<2x128xi32>
    %490 = arith.cmpi sge, %488, %489 : vector<2x128xi32>
    %c2147483647_i32_155 = arith.constant 2147483647 : i32
    %491 = vector.broadcast %c2147483647_i32_155 : i32 to vector<2x128xi32>
    %492 = arith.andi %488, %491 : vector<2x128xi32>
    %c0_i32_156 = arith.constant 0 : i32
    %493 = vector.broadcast %c0_i32_156 : i32 to vector<2x128xi32>
    %494 = arith.subi %493, %492 : vector<2x128xi32>
    %495 = arith.select %490, %488, %494 : vector<2x128xi1>, vector<2x128xi32>
    %c7_i32_157 = arith.constant 7 : i32
    %496 = vector.broadcast %c7_i32_157 : i32 to vector<2x128xi32>
    %497 = arith.shrsi %495, %496 : vector<2x128xi32>
    %c7_i32_158 = arith.constant 7 : i32
    %498 = vector.broadcast %c7_i32_158 : i32 to vector<2x128xi32>
    %499 = arith.shli %497, %498 : vector<2x128xi32>
    %500 = arith.ori %499, %8 : vector<2x128xi32>
    %cst_159 = arith.constant dense<-2147483648> : vector<2xi32>
    %501 = vector.multi_reduction <maxsi>, %500, %cst_159 [1] : vector<2x128xi32> to vector<2xi32>
    %502 = vector.shape_cast %501 : vector<2xi32> to vector<2x1xi32>
    %c127_i32_160 = arith.constant 127 : i32
    %503 = vector.broadcast %c127_i32_160 : i32 to vector<2x1xi32>
    %504 = arith.andi %502, %503 : vector<2x1xi32>
    %c127_i32_161 = arith.constant 127 : i32
    %505 = vector.broadcast %c127_i32_161 : i32 to vector<2x1xi32>
    %506 = arith.subi %505, %504 : vector<2x1xi32>
    %507 = arith.sitofp %506 : vector<2x1xi32> to vector<2x1xf32>
    %508 = vector.broadcast %507 : vector<2x1xf32> to vector<2x128xf32>
    %509 = arith.mulf %508, %14 : vector<2x128xf32>
    %510 = arith.addf %509, %11 : vector<2x128xf32>
    %511 = vector.extract_strided_slice %482 {offsets = [0, 0], sizes = [2, 128], strides = [1, 1]} : vector<2x256xf32> to vector<2x128xf32>
    %512 = arith.addf %510, %511 : vector<2x128xf32>
    %513 = arith.addf %512, %512 : vector<2x128xf32>
    %514 = arith.select %5, %513, %512 : vector<2x128xi1>, vector<2x128xf32>
    %515 = arith.negf %514 : vector<2x128xf32>
    %516 = math.exp %515 : vector<2x128xf32>
    %cst_162 = arith.constant 1.000000e+00 : f32
    %517 = vector.broadcast %cst_162 : f32 to vector<2x128xf32>
    %518 = arith.addf %517, %516 : vector<2x128xf32>
    %519 = arith.divf %517, %518 : vector<2x128xf32>
    %520 = arith.addf %519, %519 : vector<2x128xf32>
    %cst_163 = arith.constant 1.000000e+00 : f32
    %521 = vector.broadcast %cst_163 : f32 to vector<2x128xf32>
    %522 = arith.subf %520, %521 : vector<2x128xf32>
    %523 = arith.select %5, %522, %519 : vector<2x128xi1>, vector<2x128xf32>
    %c96_i32_164 = arith.constant 96 : i32
    %524 = tpu.dynamic_rotate %523 by %c96_i32_164 dim 1 : vector<2x128xf32>, i32 -> vector<2x128xf32>
    %c64_i32_165 = arith.constant 64 : i32
    %525 = tpu.dynamic_rotate %523 by %c64_i32_165 dim 1 : vector<2x128xf32>, i32 -> vector<2x128xf32>
    %c32_i32_166 = arith.constant 32 : i32
    %526 = tpu.dynamic_rotate %523 by %c32_i32_166 dim 1 : vector<2x128xf32>, i32 -> vector<2x128xf32>
    %527 = arith.mulf %524, %479 : vector<2x128xf32>
    %528 = arith.mulf %523, %525 : vector<2x128xf32>
    %529 = arith.addf %527, %528 : vector<2x128xf32>
    %530 = math.tanh %529 : vector<2x128xf32>
    %531 = arith.mulf %526, %530 : vector<2x128xf32>
    %cst_167 = arith.constant dense<0.000000e+00> : vector<2x256xf32>
    %532 = tpu.matmul %531, %19, %cst_167 {dimension_numbers = #tpu.dot_dimension_numbers<[1], [0], [0], [1], [0, 0, 1, 1], [], []>} : vector<2x128xf32>, vector<128x256xf32>, vector<2x256xf32> -> vector<2x256xf32>
    %533 = vector.extract_strided_slice %532 {offsets = [0, 128], sizes = [2, 128], strides = [1, 1]} : vector<2x256xf32> to vector<2x128xf32>
    %534 = arith.addf %533, %17 : vector<2x128xf32>
    %c7 = arith.constant 7 : index
    %c0_168 = arith.constant 0 : index
    %c0_169 = arith.constant 0 : index
    %535 = vector.load %arg9[%c7, %c0_168, %c0_169] : memref<8x2x128xf32, #tpu.memory_space<vmem>>, vector<1x2x128xf32>
    %536 = vector.shape_cast %535 : vector<1x2x128xf32> to vector<2x128xf32>
    %537 = vector.shape_cast %534 : vector<2x128xf32> to vector<1x2x128xf32>
    tpu.vector_store %arg9[%c7, %c0_168, %c0_169], %537 {strides = array<i32>} : memref<8x2x128xf32, #tpu.memory_space<vmem>>, vector<1x2x128xf32>,
    %c0_170 = arith.constant 0 : index
    %c0_171 = arith.constant 0 : index
    %538 = vector.load %arg10[%c0_170, %c0_171] : memref<2x128xf32, #tpu.memory_space<vmem>>, vector<2x128xf32>
    tpu.vector_store %arg10[%c0_170, %c0_171], %531 {strides = array<i32>} : memref<2x128xf32, #tpu.memory_space<vmem>>, vector<2x128xf32>,
    %c0_172 = arith.constant 0 : index
    %c0_173 = arith.constant 0 : index
    %539 = vector.load %arg11[%c0_172, %c0_173] : memref<2x128xf32, #tpu.memory_space<vmem>>, vector<2x128xf32>
    tpu.vector_store %arg11[%c0_172, %c0_173], %529 {strides = array<i32>} : memref<2x128xf32, #tpu.memory_space<vmem>>, vector<2x128xf32>,
    return
  }
  func.func @transform_0(%arg0: i32) -> (i32, i32) {
    %c0_i32 = arith.constant 0 : i32
    %c0_i32_0 = arith.constant 0 : i32
    %c0_i32_1 = arith.constant 0 : i32
    return %c0_i32, %c0_i32_0 : i32, i32
  }
  func.func @transform_1(%arg0: i32) -> (i32, i32) {
    %c0_i32 = arith.constant 0 : i32
    %c0_i32_0 = arith.constant 0 : i32
    %c0_i32_1 = arith.constant 0 : i32
    return %c0_i32, %c0_i32_0 : i32, i32
  }
  func.func @transform_2(%arg0: i32) -> (i32, i32) {
    %c0_i32 = arith.constant 0 : i32
    %c0_i32_0 = arith.constant 0 : i32
    %c0_i32_1 = arith.constant 0 : i32
    return %c0_i32, %c0_i32_0 : i32, i32
  }
  func.func @transform_3(%arg0: i32) -> (i32, i32) {
    %c0_i32 = arith.constant 0 : i32
    %c0_i32_0 = arith.constant 0 : i32
    %c0_i32_1 = arith.constant 0 : i32
    return %c0_i32, %c0_i32_0 : i32, i32
  }
  func.func @transform_4(%arg0: i32) -> (i32, i32) {
    %c0_i32 = arith.constant 0 : i32
    %c0_i32_0 = arith.constant 0 : i32
    %c0_i32_1 = arith.constant 0 : i32
    return %c0_i32, %c0_i32_0 : i32, i32
  }
  func.func @transform_5(%arg0: i32) -> (i32, i32) {
    %c0_i32 = arith.constant 0 : i32
    %c0_i32_0 = arith.constant 0 : i32
    %c0_i32_1 = arith.constant 0 : i32
    return %c0_i32, %c0_i32_0 : i32, i32
  }
  func.func @transform_6(%arg0: i32) -> (i32, i32) {
    %c0_i32 = arith.constant 0 : i32
    %c0_i32_0 = arith.constant 0 : i32
    %c0_i32_1 = arith.constant 0 : i32
    return %c0_i32, %c0_i32_0 : i32, i32
  }
  func.func @transform_7(%arg0: i32) -> (i32, i32) {
    %c0_i32 = arith.constant 0 : i32
    %c0_i32_0 = arith.constant 0 : i32
    %c0_i32_1 = arith.constant 0 : i32
    return %c0_i32, %c0_i32_0 : i32, i32
  }
  func.func @transform_8(%arg0: i32) -> (i32, i32, i32) {
    %c0_i32 = arith.constant 0 : i32
    %c0_i32_0 = arith.constant 0 : i32
    %c0_i32_1 = arith.constant 0 : i32
    %c0_i32_2 = arith.constant 0 : i32
    return %c0_i32, %c0_i32_0, %c0_i32_1 : i32, i32, i32
  }
  func.func @transform_9(%arg0: i32) -> (i32, i32) {
    %c0_i32 = arith.constant 0 : i32
    %c0_i32_0 = arith.constant 0 : i32
    %c0_i32_1 = arith.constant 0 : i32
    return %c0_i32, %c0_i32_0 : i32, i32
  }
  func.func @transform_10(%arg0: i32) -> (i32, i32) {
    %c0_i32 = arith.constant 0 : i32
    %c0_i32_0 = arith.constant 0 : i32
    %c0_i32_1 = arith.constant 0 : i32
    return %c0_i32, %c0_i32_0 : i32, i32
  }
}

</mosaic_0001>

<bundles_post_ra>
// kernel: tpu_custom_call.1
= control target key start
LH: loop header
LB: loop body
LE: loop exit
PB: predicated region body
PF: predicated region fallthrough
CT: control target
= control target key end

     0   :  { %16 = vsyncpa [#allocation3], 0  ;;  %s2523_s0 = inlined_call_operand.vmem [shape: f32[16,4], index: 0, kind: input, shape index: {}]   ;;  %s2524_s1 = inlined_call_operand.vmem [shape: f32[4,128], index: 1, kind: input, shape index: {}]   ;;  %s2525_s2 = inlined_call_operand.hbm [shape: f32[128,128], index: 2, kind: input, shape index: {}]   ;;  %s2526_s3 = inlined_call_operand.vmem [shape: f32[1,128], index: 3, kind: input, shape index: {}]   ;;  %s2527_s4 = inlined_call_operand.vmem [shape: f32[1,128], index: 4, kind: input, shape index: {}]   ;;  %s2528_s5 = inlined_call_operand.hbm [shape: f32[128,256], index: 5, kind: input, shape index: {}]   ;;  %s2529_s6 = inlined_call_operand.vmem [shape: f32[1,128], index: 6, kind: input, shape index: {}]   ;;  %s2530_s7 = inlined_call_operand.vmem [shape: f32[1,128], index: 7, kind: input, shape index: {}]   ;;  %s2531_s8 = inlined_call_operand.hbm [shape: f32[8,2,128], index: 8, kind: output, shape index: {0}]   ;;  %s2532_s9 = inlined_call_operand.hbm [shape: f32[2,128], index: 9, kind: output, shape index: {1}]   ;;  %s2533_s10 = inlined_call_operand.hbm [shape: f32[2,128], index: 10, kind: output, shape index: {2}]  }
   0x1   :  { %17 = vsyncpa [#allocation6], 0 }
   0x2   :  { %18 = vsyncpa [#allocation4], 0 }
   0x3   :  { %19 = vsyncpa [#allocation9], 0  ;;  %s28_s15 = sshll.u32 %s2525_s2, 4  ;;  %s1741_s16 = smov [#allocation2]   ;;  %s29_s15 = int_to_ptr.hbm [resolvable:$true] %s28_s15 }
   0x4   :  { %s30_s17 = sshll.u32 %s1741_s16, 4  ;;  %s45_s20 = sshll.u32 %s2528_s5, 4  ;;  %s31_s17 = int_to_ptr.vmem [resolvable:$true] %s30_s17  ;;  %s46_s20 = int_to_ptr.hbm [resolvable:$true] %s45_s20 }
   0x5   :  { %s1742_s21 = smov 128   ;;  %s1743_s22 = smov 8  }
   0x6   :  { %36 = dma.hbm_to_vmem [thread:$0]  %s29_s15, 2048, %s31_s17, [#allocation3], %s1742_s21, %s1742_s21, %s1743_s22  }
   0x7   :  { %s1744_s23 = smov [#allocation5]   ;;  %s1745_s25 = smov 256  }
   0x8   :  { %s47_s24 = sshll.u32 %s1744_s23, 4  ;;  %s1746_s26 = smov 16   ;;  %s48_s24 = int_to_ptr.vmem [resolvable:$true] %s47_s24 }
   0x9   :  { %53 = dma.hbm_to_vmem [thread:$0]  %s46_s20, 4096, %s48_s24, [#allocation6], %s1745_s25, %s1745_s25, %s1746_s26  }
   0xa   :  { %1733 = dma.done.wait [#allocation3], 2048  }
   0xb   :  { %1734 = vsyncadd [#allocation3], 4294965248 }
   0xc   :  { %1735 = dma.done.wait [#allocation6], 4096  }
   0xd   :  { %1736 = vsyncadd [#allocation6], 4294963200  ;;  %v1816_v0 = vld [vmem:[#allocation2 + $0x78] sm:$0xff]  ;;  %v1818_v1 = vld [vmem:[#allocation2 + $0x70] sm:$0xff]  ;;  %v1747_v2 = vmov 0.0   ;;  %vm146_vm0 = vcmask 1043456   ;;  %v66_v19 = vlaneseq }
   0xe   :  { %693 = vst [vmem:[#allocation7] sm:$0x3] %v1747_v2  ;;  %173 = vmatpush.msra.mxu1 %v1816_v0  ;;  %229 = vmatpush.msra.mxu2 %v1816_v0  ;;  %v1823_v3 = vld [vmem:[#allocation2 + $0x68] sm:$0xff]  ;;  %vm139_vm1 = vcmask 31744   ;;  %v1828_v4 = vld [vmem:[#allocation2 + $0x60] sm:$0xff]  ;;  %v1838_v7 = vld [vmem:[#allocation2 + $0x58] sm:$0xff] }
   0xf   :  { %297 = vmatpush.msra.mxu3 %v1816_v0  ;;  %v134_v5 = vld [vmem:[%s2524_s1] sm:$0xf]  ;;  %v1844_v8 = vld [vmem:[#allocation2 + $0x50] sm:$0xff]  ;;  %v1850_v9 = vld [vmem:[#allocation2 + $0x48] sm:$0xff]  ;;  %v1990_v22 = vand.u32 127, %v66_v19  ;;  %s1749_s30 = smov 96  }
  0x10   :  { %174 = vmatpush.msra.mxu1 %v1818_v1  ;;  %230 = vmatpush.msra.mxu2 %v1818_v1  ;;  %v132_v6 = vld [vmem:[%s2523_s0] sm:$0xff]  ;;  %v1862_v11 = vld [vmem:[#allocation2 + $0x38] sm:$0xff]  ;;  %v1868_v12 = vld [vmem:[#allocation2 + $0x30] sm:$0xff]  ;;  %s1750_s11 = smov 64   ;;  %s1439_s24 = sshll.u32 %s2532_s9, 4  ;;  %s1440_s24 = int_to_ptr.hbm [resolvable:$true] %s1439_s24 }
  0x11   :  { %298 = vmatpush.msra.mxu3 %v1818_v1  ;;  %1470 = vmatpush.msk.msra.mxu0 %vm146_vm0, %v134_v5  ;;  %v1856_v10 = vld [vmem:[#allocation2 + $0x40] sm:$0xff]  ;;  %v1874_v13 = vld [vmem:[#allocation2 + $0x28] sm:$0xff]  ;;  %v1886_v15 = vld [vmem:[#allocation2 + $0x18] sm:$0xff]  ;;  %vm68_vm2 = vcmp.ge.s32.totalorder %v1990_v22, 64  ;;  %vm69_vm3 = vcmp.lt.s32.totalorder %v1990_v22, 96  ;;  %s1450_s2 = sshll.u32 %s2533_s10, 4  ;;  %s1451_s2 = int_to_ptr.hbm [resolvable:$true] %s1450_s2 }
  0x12   :  { %175 = vmatpush.msra.mxu1 %v1823_v3  ;;  %1471 = vmatmul.msk.f32.vlgmr.msra.gmra.mxu0 %vm139_vm1, %v132_v6  ;;  %v1880_v14 = vld [vmem:[#allocation2 + $0x20] sm:$0xff]  ;;  %v1892_v16 = vld [vmem:[#allocation2 + $0x10] sm:$0xff]  ;;  %v1898_v17 = vld [vmem:[#allocation2 + $0x8] sm:$0xff]  ;;  %s1752_s5 = smov [#allocation10]   ;;  %s1425_s29 = sshll.u32 %s2531_s8, 4  ;;  %s1426_s29 = int_to_ptr.hbm [resolvable:$true] %s1425_s29 }
  0x13   :  { %231 = vmatpush.msra.mxu2 %v1823_v3  ;;  %299 = vmatpush.msra.mxu3 %v1823_v3  ;;  %v1904_v18 = vld [vmem:[#allocation2] sm:$0xff]  ;;  %vm1998_vm4 = vmand %vm68_vm2, %vm69_vm3  ;;  %s1448_s27 = sshll.u32 %s1752_s5, 4  ;;  %s1754_s9 = smov 2   ;;  %s1449_s27 = int_to_ptr.vmem [resolvable:$true] %s1448_s27 }
  0x14   :  { %176 = vmatpush.msra.mxu1 %v1828_v4  ;;  %365 = vmatpush.msrb.mxu0 %v1816_v0  ;;  %v1988_v20 = vld [vmem:[%s2526_s3] ss:$0 sm:$0xff]  ;;  %s1748_s3 = smov 32  }
  0x15   :  { %232 = vmatpush.msra.mxu2 %v1828_v4  ;;  %300 = vmatpush.msra.mxu3 %v1828_v4 }
  0x16   :  { %177 = vmatpush.msra.mxu1 %v1838_v7  ;;  %366 = vmatpush.msrb.mxu0 %v1818_v1 }
  0x17   :  { %233 = vmatpush.msra.mxu2 %v1838_v7  ;;  %301 = vmatpush.msra.mxu3 %v1838_v7 }
  0x18   :  { %178 = vmatpush.msra.mxu1 %v1844_v8  ;;  %367 = vmatpush.msrb.mxu0 %v1823_v3 }
  0x19   :  { %234 = vmatpush.msra.mxu2 %v1844_v8  ;;  %302 = vmatpush.msra.mxu3 %v1844_v8 }
  0x1a   :  { %179 = vmatpush.msra.mxu1 %v1850_v9  ;;  %368 = vmatpush.msrb.mxu0 %v1828_v4 }
  0x1b   :  { %235 = vmatpush.msra.mxu2 %v1850_v9  ;;  %303 = vmatpush.msra.mxu3 %v1850_v9 }
  0x1c   :  { %180 = vmatpush.msra.mxu1 %v1856_v10  ;;  %369 = vmatpush.msrb.mxu0 %v1838_v7 }
  0x1d   :  { %236 = vmatpush.msra.mxu2 %v1856_v10  ;;  %304 = vmatpush.msra.mxu3 %v1856_v10 }
  0x1e   :  { %181 = vmatpush.msra.mxu1 %v1862_v11  ;;  %370 = vmatpush.msrb.mxu0 %v1844_v8 }
  0x1f   :  { %237 = vmatpush.msra.mxu2 %v1862_v11  ;;  %305 = vmatpush.msra.mxu3 %v1862_v11 }
  0x20   :  { %182 = vmatpush.msra.mxu1 %v1868_v12  ;;  %371 = vmatpush.msrb.mxu0 %v1850_v9 }
  0x21   :  { %238 = vmatpush.msra.mxu2 %v1868_v12  ;;  %306 = vmatpush.msra.mxu3 %v1868_v12 }
  0x22   :  { %183 = vmatpush.msra.mxu1 %v1874_v13  ;;  %372 = vmatpush.msrb.mxu0 %v1856_v10 }
  0x23   :  { %239 = vmatpush.msra.mxu2 %v1874_v13  ;;  %307 = vmatpush.msra.mxu3 %v1874_v13 }
  0x24   :  { %184 = vmatpush.msra.mxu1 %v1880_v14  ;;  %373 = vmatpush.msrb.mxu0 %v1862_v11 }
  0x25   :  { %240 = vmatpush.msra.mxu2 %v1880_v14  ;;  %308 = vmatpush.msra.mxu3 %v1880_v14 }
  0x26   :  { %185 = vmatpush.msra.mxu1 %v1886_v15  ;;  %374 = vmatpush.msrb.mxu0 %v1868_v12 }
  0x27   :  { %241 = vmatpush.msra.mxu2 %v1886_v15  ;;  %309 = vmatpush.msra.mxu3 %v1886_v15 }
  0x28   :  { %186 = vmatpush.msra.mxu1 %v1892_v16  ;;  %375 = vmatpush.msrb.mxu0 %v1874_v13 }
  0x29   :  { %242 = vmatpush.msra.mxu2 %v1892_v16  ;;  %310 = vmatpush.msra.mxu3 %v1892_v16 }
  0x2a   :  { %187 = vmatpush.msra.mxu1 %v1898_v17  ;;  %376 = vmatpush.msrb.mxu0 %v1880_v14 }
  0x2b   :  { %243 = vmatpush.msra.mxu2 %v1898_v17  ;;  %311 = vmatpush.msra.mxu3 %v1898_v17 }
  0x2c   :  { %188 = vmatpush.msra.mxu1 %v1904_v18  ;;  %377 = vmatpush.msrb.mxu0 %v1886_v15 }
  0x2d   :  { %189 = vmatmul.f32.vlgmr.msra.gmra.mxu1 %v1747_v2  ;;  %244 = vmatpush.msra.mxu2 %v1904_v18 }
  0x2e   :  { %312 = vmatpush.msra.mxu3 %v1904_v18  ;;  %433 = vmatpush.msrb.mxu1 %v1816_v0 }
  0x2f   :  { %489 = vmatpush.msrb.mxu2 %v1816_v0  ;;  %378 = vmatpush.msrb.mxu0 %v1892_v16 }
  0x30   :  { %557 = vmatpush.msrb.mxu3 %v1816_v0  ;;  %434 = vmatpush.msrb.mxu1 %v1818_v1 }
  0x31   :  { %490 = vmatpush.msrb.mxu2 %v1818_v1  ;;  %379 = vmatpush.msrb.mxu0 %v1898_v17 }
  0x32   :  { %558 = vmatpush.msrb.mxu3 %v1818_v1  ;;  %435 = vmatpush.msrb.mxu1 %v1823_v3 }
  0x33   :  { %491 = vmatpush.msrb.mxu2 %v1823_v3  ;;  %380 = vmatpush.msrb.mxu0 %v1904_v18 }
  0x34   :  { %559 = vmatpush.msrb.mxu3 %v1823_v3  ;;  %436 = vmatpush.msrb.mxu1 %v1828_v4 }
  0x35   :  { %492 = vmatpush.msrb.mxu2 %v1828_v4  ;;  %625 = vmatpush.msra.mxu0 %v1816_v0 }
  0x36   :  { %560 = vmatpush.msrb.mxu3 %v1828_v4  ;;  %437 = vmatpush.msrb.mxu1 %v1838_v7 }
  0x37   :  { %493 = vmatpush.msrb.mxu2 %v1838_v7  ;;  %626 = vmatpush.msra.mxu0 %v1818_v1 }
  0x38   :  { %561 = vmatpush.msrb.mxu3 %v1838_v7  ;;  %438 = vmatpush.msrb.mxu1 %v1844_v8 }
  0x39   :  { %494 = vmatpush.msrb.mxu2 %v1844_v8  ;;  %627 = vmatpush.msra.mxu0 %v1823_v3 }
  0x3a   :  { %562 = vmatpush.msrb.mxu3 %v1844_v8  ;;  %439 = vmatpush.msrb.mxu1 %v1850_v9 }
  0x3b   :  { %495 = vmatpush.msrb.mxu2 %v1850_v9  ;;  %628 = vmatpush.msra.mxu0 %v1828_v4 }
  0x3c   :  { %563 = vmatpush.msrb.mxu3 %v1850_v9  ;;  %440 = vmatpush.msrb.mxu1 %v1856_v10 }
  0x3d   :  { %496 = vmatpush.msrb.mxu2 %v1856_v10  ;;  %629 = vmatpush.msra.mxu0 %v1838_v7 }
  0x3e   :  { %564 = vmatpush.msrb.mxu3 %v1856_v10  ;;  %441 = vmatpush.msrb.mxu1 %v1862_v11 }
  0x3f   :  { %497 = vmatpush.msrb.mxu2 %v1862_v11  ;;  %630 = vmatpush.msra.mxu0 %v1844_v8 }
  0x40   :  { %565 = vmatpush.msrb.mxu3 %v1862_v11  ;;  %442 = vmatpush.msrb.mxu1 %v1868_v12 }
  0x41   :  { %498 = vmatpush.msrb.mxu2 %v1868_v12  ;;  %631 = vmatpush.msra.mxu0 %v1850_v9 }
  0x42   :  { %566 = vmatpush.msrb.mxu3 %v1868_v12  ;;  %443 = vmatpush.msrb.mxu1 %v1874_v13 }
  0x43   :  { %499 = vmatpush.msrb.mxu2 %v1874_v13  ;;  %632 = vmatpush.msra.mxu0 %v1856_v10 }
  0x44   :  { %567 = vmatpush.msrb.mxu3 %v1874_v13  ;;  %444 = vmatpush.msrb.mxu1 %v1880_v14 }
  0x45   :  { %500 = vmatpush.msrb.mxu2 %v1880_v14  ;;  %633 = vmatpush.msra.mxu0 %v1862_v11 }
  0x46   :  { %568 = vmatpush.msrb.mxu3 %v1880_v14  ;;  %445 = vmatpush.msrb.mxu1 %v1886_v15 }
  0x47   :  { %501 = vmatpush.msrb.mxu2 %v1886_v15  ;;  %634 = vmatpush.msra.mxu0 %v1868_v12 }
  0x48   :  { %569 = vmatpush.msrb.mxu3 %v1886_v15  ;;  %446 = vmatpush.msrb.mxu1 %v1892_v16 }
  0x49   :  { %502 = vmatpush.msrb.mxu2 %v1892_v16  ;;  %635 = vmatpush.msra.mxu0 %v1874_v13 }
  0x4a   :  { %570 = vmatpush.msrb.mxu3 %v1892_v16  ;;  %447 = vmatpush.msrb.mxu1 %v1898_v17 }
  0x4b   :  { %503 = vmatpush.msrb.mxu2 %v1898_v17  ;;  %636 = vmatpush.msra.mxu0 %v1880_v14 }
  0x4c   :  { %571 = vmatpush.msrb.mxu3 %v1898_v17  ;;  %448 = vmatpush.msrb.mxu1 %v1904_v18 }
  0x4d   :  { %504 = vmatpush.msrb.mxu2 %v1904_v18  ;;  %637 = vmatpush.msra.mxu0 %v1886_v15 }
  0x4e   :  { %572 = vmatpush.msrb.mxu3 %v1904_v18 }
  0x4f   :  { %638 = vmatpush.msra.mxu0 %v1892_v16 }
  0x51   :  { %639 = vmatpush.msra.mxu0 %v1898_v17 }
  0x53   :  { %640 = vmatpush.msra.mxu0 %v1904_v18 }
  0x8f   :  { %v167_v21 = vpop.f32.mrf.mxu0 }
  0x90   :  { %v1993_v23 = vadd.f32 %v1988_v20, %v167_v21 }
  0xaa   :  { %v190_v24 = vpop.f32.mrf.mxu1 }
  0xab   :  { %v193_v25 = vadd.f32 %v190_v24, %v1993_v23 }
  0xad   :  { %v194_v27 = vadd.f32 %v193_v25, %v193_v25 }
  0xaf   :  { %v195_v28 = vsel %vm1998_vm4, %v194_v27, %v193_v25 }
  0xb0   :  { %v1473_v29 = vmul.f32 -1.442695, %v195_v28 }
  0xb2   :  { %1521 = vpow2.f32 %v1473_v29 }
  0xb8   :  { %v1522_v30 = vpop.eup %1521 }
  0xb9   :  { %v199_v31 = vadd.f32 1.0, %v1522_v30 }
  0xbb   :  { %1523 = vrcp.f32 %v199_v31  ;;  %v211_v35 = vand.u32 2147483648, %v199_v31  ;;  %v209_v37 = vand.u32 2147483647, %v199_v31  ;;  %vm205_vm6 = vweird.f32 %v199_v31 }
  0xbd   :  { %v212_v39 = vor.u32 1.1754944e-38, %v211_v35  ;;  %vm210_vm8 = vcmp.eq.f32.partialorder %v209_v37, 8.507059e+37 }
  0xc1   :  { %v1524_v32 = vpop.eup %1523 }
  0xc2   :  { %v201_v33 = vmul.f32 %v1524_v32, %v199_v31  ;;  %vm206_vm5 = vweird.f32 %v1524_v32 }
  0xc3   :  { %vm207_vm7 = vmor %vm205_vm6, %vm206_vm5 }
  0xc4   :  { %v202_v34 = vsub.f32 1.0, %v201_v33 }
  0xc6   :  { %v203_v36 = vmul.f32 %v1524_v32, %v202_v34 }
  0xc8   :  { %v204_v38 = vadd.f32 %v1524_v32, %v203_v36 }
  0xca   :  { %v208_v40 = vsel %vm207_vm7, %v1524_v32, %v204_v38 }
  0xcb   :  { %v213_v41 = vsel %vm210_vm8, %v212_v39, %v208_v40 }
  0xcc   :  { %v215_v42 = vadd.f32 %v213_v41, %v213_v41 }
  0xce   :  { %v1474_v43 = vadd.f32 -1.0, %v215_v42 }
  0xd0   :  { %v217_v44 = vsel %vm1998_vm4, %v1474_v43, %v213_v41 }
  0xd1   :  { %222 = vrot.lane.b32.xlu1 %v217_v44, %s1748_s3  ;;  %218 = vrot.lane.b32.xlu0 %v217_v44, %s1749_s30 }
  0xd9   :  { %220 = vrot.lane.b32.xlu0 %v217_v44, %s1750_s11 }
 0x143   :  { %v219_v45 = vpop.permute.xlu0 %218  ;;  %v223_v51 = vpop.permute.xlu1 %222 }
 0x144   :  { %v224_v47 = vmul.f32 0.0, %v219_v45 }
 0x14b   :  { %v221_v46 = vpop.permute.xlu0 %220 }
 0x14c   :  { %v225_v48 = vmul.f32 %v221_v46, %v217_v44 }
 0x14e   :  { %v226_v49 = vadd.f32 %v225_v48, %v224_v47  ;;  %v133_v47 = vld [vmem:[%s2523_s0 + $0x8] sm:$0xff] }
 0x14f   :  { %1472 = vmatmul.msk.f32.gmra.mxu0 %vm139_vm1, %v133_v47 }
 0x150   :  { %1525 = vtanh.f32 %v226_v49 }
 0x156   :  { %v1526_v50 = vpop.eup %1525 }
 0x157   :  { %v228_v52 = vmul.f32 %v1526_v50, %v223_v51 }
 0x159   :  { %245 = vmatmul.f32.vlgmr.msra.gmra.mxu2 %v228_v52 }
 0x1dc   :  { %v246_v53 = vpop.f32.mrf.mxu2 }
 0x1dd   :  { %v250_v54 = vrot.slane %v246_v53, 6 }
 0x1df   :  { %v252_v55 = vadd.f32 %v250_v54, %v1993_v23 }
 0x1e1   :  { %v253_v56 = vadd.f32 %v252_v55, %v252_v55 }
 0x1e3   :  { %v254_v57 = vsel %vm1998_vm4, %v253_v56, %v252_v55 }
 0x1e4   :  { %v1475_v58 = vmul.f32 -1.442695, %v254_v57 }
 0x1e6   :  { %1527 = vpow2.f32 %v1475_v58  ;;  %v170_v58 = vpop.f32.mrf.mxu0 }
 0x1ec   :  { %v1528_v59 = vpop.eup %1527 }
 0x1ed   :  { %v258_v60 = vadd.f32 1.0, %v1528_v59 }
 0x1ef   :  { %1529 = vrcp.f32 %v258_v60  ;;  %v270_v0 = vand.u32 2147483648, %v258_v60  ;;  %v268_v2 = vand.u32 2147483647, %v258_v60  ;;  %vm264_vm10 = vweird.f32 %v258_v60 }
 0x1f1   :  { %v271_v4 = vor.u32 1.1754944e-38, %v270_v0  ;;  %vm269_vm12 = vcmp.eq.f32.partialorder %v268_v2, 8.507059e+37 }
 0x1f5   :  { %v1530_v61 = vpop.eup %1529 }
 0x1f6   :  { %v260_v62 = vmul.f32 %v1530_v61, %v258_v60  ;;  %vm265_vm9 = vweird.f32 %v1530_v61 }
 0x1f7   :  { %vm266_vm11 = vmor %vm264_vm10, %vm265_vm9 }
 0x1f8   :  { %v261_v63 = vsub.f32 1.0, %v260_v62 }
 0x1fa   :  { %v262_v1 = vmul.f32 %v1530_v61, %v261_v63 }
 0x1fc   :  { %v263_v3 = vadd.f32 %v1530_v61, %v262_v1 }
 0x1fe   :  { %v267_v5 = vsel %vm266_vm11, %v1530_v61, %v263_v3 }
 0x1ff   :  { %v272_v6 = vsel %vm269_vm12, %v271_v4, %v267_v5 }
 0x200   :  { %v274_v7 = vadd.f32 %v272_v6, %v272_v6 }
 0x202   :  { %v1476_v8 = vadd.f32 -1.0, %v274_v7 }
 0x204   :  { %v276_v9 = vsel %vm1998_vm4, %v1476_v8, %v272_v6 }
 0x205   :  { %v278_v10 = vrot.slane %v276_v9, 2 }
 0x207   :  { %280 = vrot.lane.b32.xlu2 %v278_v10, %s1749_s30  ;;  %282 = vrot.lane.b32.xlu1 %v278_v10, %s1750_s11 }
 0x20f   :  { %284 = vrot.lane.b32.xlu2 %v278_v10, %s1748_s3 }
 0x261   :  { %v281_v13 = vpop.permute.xlu2 %280 }
 0x262   :  { %v286_v15 = vmul.f32 %v281_v13, %v226_v49 }
 0x269   :  { %v285_v19 = vpop.permute.xlu2 %284 }
 0x279   :  { %v283_v11 = vpop.permute.xlu1 %282 }
 0x27a   :  { %v288_v12 = vrot.slane %v283_v11, 6 }
 0x27c   :  { %v290_v14 = vmul.f32 %v288_v12, %v276_v9 }
 0x27e   :  { %v292_v16 = vrot.slane %v290_v14, 2 }
 0x280   :  { %v294_v17 = vadd.f32 %v292_v16, %v286_v15 }
 0x282   :  { %1531 = vtanh.f32 %v294_v17 }
 0x288   :  { %v1532_v18 = vpop.eup %1531 }
 0x289   :  { %v296_v21 = vmul.f32 %v1532_v18, %v285_v19 }
 0x28b   :  { %313 = vmatmul.f32.vlgmr.msra.gmra.mxu3 %v296_v21 }
 0x30e   :  { %v314_v24 = vpop.f32.mrf.mxu3 }
 0x30f   :  { %v318_v25 = vrot.slane %v314_v24, 4 }
 0x311   :  { %v320_v27 = vadd.f32 %v318_v25, %v1993_v23 }
 0x313   :  { %v321_v28 = vadd.f32 %v320_v27, %v320_v27 }
 0x315   :  { %v322_v29 = vsel %vm1998_vm4, %v321_v28, %v320_v27 }
 0x316   :  { %v1477_v30 = vmul.f32 -1.442695, %v322_v29 }
 0x318   :  { %1533 = vpow2.f32 %v1477_v30  ;;  %v2038_v30 = vadd.f32 %v1988_v20, %v170_v58 }
 0x31e   :  { %v1534_v31 = vpop.eup %1533 }
 0x31f   :  { %v326_v32 = vadd.f32 1.0, %v1534_v31 }
 0x321   :  { %1535 = vrcp.f32 %v326_v32  ;;  %v338_v36 = vand.u32 2147483648, %v326_v32  ;;  %v336_v38 = vand.u32 2147483647, %v326_v32  ;;  %vm332_vm14 = vweird.f32 %v326_v32 }
 0x323   :  { %v339_v40 = vor.u32 1.1754944e-38, %v338_v36  ;;  %vm337_vm0 = vcmp.eq.f32.partialorder %v336_v38, 8.507059e+37 }
 0x327   :  { %v1536_v33 = vpop.eup %1535 }
 0x328   :  { %v328_v34 = vmul.f32 %v1536_v33, %v326_v32  ;;  %vm333_vm13 = vweird.f32 %v1536_v33 }
 0x329   :  { %vm334_vm15 = vmor %vm332_vm14, %vm333_vm13 }
 0x32a   :  { %v329_v35 = vsub.f32 1.0, %v328_v34 }
 0x32c   :  { %v330_v37 = vmul.f32 %v1536_v33, %v329_v35 }
 0x32e   :  { %v331_v39 = vadd.f32 %v1536_v33, %v330_v37 }
 0x330   :  { %v335_v41 = vsel %vm334_vm15, %v1536_v33, %v331_v39 }
 0x331   :  { %v340_v42 = vsel %vm337_vm0, %v339_v40, %v335_v41 }
 0x332   :  { %v342_v43 = vadd.f32 %v340_v42, %v340_v42 }
 0x334   :  { %v1478_v44 = vadd.f32 -1.0, %v342_v43 }
 0x336   :  { %v344_v45 = vsel %vm1998_vm4, %v1478_v44, %v340_v42 }
 0x337   :  { %v346_v46 = vrot.slane %v344_v45, 4 }
 0x339   :  { %352 = vrot.lane.b32.xlu2 %v346_v46, %s1748_s3  ;;  %348 = vrot.lane.b32.xlu1 %v346_v46, %s1749_s30 }
 0x33a   :  { %350 = vrot.lane.b32.xlu0 %v346_v46, %s1750_s11 }
 0x393   :  { %v353_v56 = vpop.permute.xlu2 %352 }
 0x3ab   :  { %v349_v50 = vpop.permute.xlu1 %348 }
 0x3ac   :  { %v351_v48 = vpop.permute.xlu0 %350  ;;  %v354_v52 = vmul.f32 %v349_v50, %v294_v17 }
 0x3ad   :  { %v356_v49 = vrot.slane %v351_v48, 4 }
 0x3af   :  { %v358_v51 = vmul.f32 %v356_v49, %v344_v45 }
 0x3b1   :  { %v360_v53 = vrot.slane %v358_v51, 4 }
 0x3b3   :  { %v362_v54 = vadd.f32 %v360_v53, %v354_v52 }
 0x3b5   :  { %1537 = vtanh.f32 %v362_v54 }
 0x3bb   :  { %v1538_v55 = vpop.eup %1537 }
 0x3bc   :  { %v364_v57 = vmul.f32 %v1538_v55, %v353_v56 }
 0x3be   :  { %381 = vmatmul.f32.vlgmr.msrb.gmra.mxu0 %v364_v57 }
 0x43b   :  { %v382_v59 = vpop.f32.mrf.mxu0 }
 0x43c   :  { %v386_v60 = vrot.slane %v382_v59, 2 }
 0x43e   :  { %v388_v61 = vadd.f32 %v386_v60, %v1993_v23 }
 0x440   :  { %v389_v62 = vadd.f32 %v388_v61, %v388_v61 }
 0x442   :  { %v390_v63 = vsel %vm1998_vm4, %v389_v62, %v388_v61 }
 0x443   :  { %v1479_v0 = vmul.f32 -1.442695, %v390_v63 }
 0x445   :  { %1539 = vpow2.f32 %v1479_v0 }
 0x44b   :  { %v1540_v1 = vpop.eup %1539 }
 0x44c   :  { %v394_v2 = vadd.f32 1.0, %v1540_v1 }
 0x44e   :  { %1541 = vrcp.f32 %v394_v2  ;;  %v406_v6 = vand.u32 2147483648, %v394_v2  ;;  %v404_v8 = vand.u32 2147483647, %v394_v2  ;;  %vm400_vm2 = vweird.f32 %v394_v2 }
 0x450   :  { %v407_v23 = vor.u32 1.1754944e-38, %v406_v6  ;;  %vm405_vm5 = vcmp.eq.f32.partialorder %v404_v8, 8.507059e+37 }
 0x454   :  { %v1542_v3 = vpop.eup %1541 }
 0x455   :  { %v396_v4 = vmul.f32 %v1542_v3, %v394_v2  ;;  %vm401_vm1 = vweird.f32 %v1542_v3 }
 0x456   :  { %vm402_vm3 = vmor %vm400_vm2, %vm401_vm1 }
 0x457   :  { %v397_v5 = vsub.f32 1.0, %v396_v4 }
 0x459   :  { %v398_v7 = vmul.f32 %v1542_v3, %v397_v5 }
 0x45b   :  { %v399_v9 = vadd.f32 %v1542_v3, %v398_v7 }
 0x45d   :  { %v403_v10 = vsel %vm402_vm3, %v1542_v3, %v399_v9 }
 0x45e   :  { %v408_v11 = vsel %vm405_vm5, %v407_v23, %v403_v10 }
 0x45f   :  { %v410_v12 = vadd.f32 %v408_v11, %v408_v11 }
 0x461   :  { %v1480_v13 = vadd.f32 -1.0, %v410_v12 }
 0x463   :  { %v412_v14 = vsel %vm1998_vm4, %v1480_v13, %v408_v11 }
 0x464   :  { %v414_v15 = vrot.slane %v412_v14, 6 }
 0x466   :  { %420 = vrot.lane.b32.xlu2 %v414_v15, %s1748_s3  ;;  %416 = vrot.lane.b32.xlu1 %v414_v15, %s1749_s30 }
 0x467   :  { %418 = vrot.lane.b32.xlu0 %v414_v15, %s1750_s11 }
 0x4c0   :  { %v421_v28 = vpop.permute.xlu2 %420 }
 0x4d8   :  { %v417_v18 = vpop.permute.xlu1 %416 }
 0x4d9   :  { %v419_v16 = vpop.permute.xlu0 %418  ;;  %v422_v21 = vmul.f32 %v417_v18, %v362_v54 }
 0x4da   :  { %v424_v17 = vrot.slane %v419_v16, 2 }
 0x4dc   :  { %v426_v19 = vmul.f32 %v424_v17, %v412_v14 }
 0x4de   :  { %v428_v24 = vrot.slane %v426_v19, 6 }
 0x4e0   :  { %v430_v25 = vadd.f32 %v428_v24, %v422_v21 }
 0x4e2   :  { %1543 = vtanh.f32 %v430_v25 }
 0x4e8   :  { %v1544_v27 = vpop.eup %1543 }
 0x4e9   :  { %v432_v29 = vmul.f32 %v1544_v27, %v421_v28 }
 0x4eb   :  { %449 = vmatmul.f32.vlgmr.msrb.gmra.mxu1 %v432_v29 }
 0x568   :  { %v450_v31 = vpop.f32.mrf.mxu1 }
 0x569   :  { %v453_v32 = vadd.f32 %v450_v31, %v2038_v30 }
 0x56b   :  { %v454_v33 = vadd.f32 %v453_v32, %v453_v32 }
 0x56d   :  { %v455_v34 = vsel %vm1998_vm4, %v454_v33, %v453_v32 }
 0x56e   :  { %v1481_v35 = vmul.f32 -1.442695, %v455_v34 }
 0x570   :  { %1545 = vpow2.f32 %v1481_v35 }
 0x576   :  { %v1546_v36 = vpop.eup %1545 }
 0x577   :  { %v459_v37 = vadd.f32 1.0, %v1546_v36 }
 0x579   :  { %1547 = vrcp.f32 %v459_v37  ;;  %v471_v41 = vand.u32 2147483648, %v459_v37  ;;  %v469_v20 = vand.u32 2147483647, %v459_v37  ;;  %vm465_vm7 = vweird.f32 %v459_v37 }
 0x57b   :  { %v472_v44 = vor.u32 1.1754944e-38, %v471_v41  ;;  %vm470_vm9 = vcmp.eq.f32.partialorder %v469_v20, 8.507059e+37 }
 0x57f   :  { %v1548_v38 = vpop.eup %1547 }
 0x580   :  { %v461_v39 = vmul.f32 %v1548_v38, %v459_v37  ;;  %vm466_vm6 = vweird.f32 %v1548_v38 }
 0x581   :  { %vm467_vm8 = vmor %vm465_vm7, %vm466_vm6 }
 0x582   :  { %v462_v40 = vsub.f32 1.0, %v461_v39 }
 0x584   :  { %v463_v42 = vmul.f32 %v1548_v38, %v462_v40 }
 0x586   :  { %v464_v43 = vadd.f32 %v1548_v38, %v463_v42 }
 0x588   :  { %v468_v45 = vsel %vm467_vm8, %v1548_v38, %v464_v43 }
 0x589   :  { %v473_v46 = vsel %vm470_vm9, %v472_v44, %v468_v45 }
 0x58a   :  { %v475_v47 = vadd.f32 %v473_v46, %v473_v46 }
 0x58c   :  { %v1482_v48 = vadd.f32 -1.0, %v475_v47 }
 0x58e   :  { %v477_v49 = vsel %vm1998_vm4, %v1482_v48, %v473_v46 }
 0x58f   :  { %482 = vrot.lane.b32.xlu2 %v477_v49, %s1748_s3  ;;  %480 = vrot.lane.b32.xlu1 %v477_v49, %s1750_s11 }
 0x590   :  { %478 = vrot.lane.b32.xlu0 %v477_v49, %s1749_s30 }
 0x5e9   :  { %v483_v56 = vpop.permute.xlu2 %482 }
 0x601   :  { %v481_v50 = vpop.permute.xlu1 %480 }
 0x602   :  { %v485_v51 = vmul.f32 %v481_v50, %v477_v49  ;;  %v479_v52 = vpop.permute.xlu0 %478 }
 0x603   :  { %v484_v53 = vmul.f32 %v479_v52, %v430_v25 }
 0x605   :  { %v486_v54 = vadd.f32 %v485_v51, %v484_v53 }
 0x607   :  { %1549 = vtanh.f32 %v486_v54 }
 0x60d   :  { %v1550_v55 = vpop.eup %1549 }
 0x60e   :  { %v488_v57 = vmul.f32 %v1550_v55, %v483_v56 }
 0x610   :  { %505 = vmatmul.f32.vlgmr.msrb.gmra.mxu2 %v488_v57 }
 0x693   :  { %v506_v58 = vpop.f32.mrf.mxu2 }
 0x694   :  { %v510_v59 = vrot.slane %v506_v58, 6 }
 0x696   :  { %v512_v60 = vadd.f32 %v510_v59, %v2038_v30 }
 0x698   :  { %v513_v61 = vadd.f32 %v512_v60, %v512_v60 }
 0x69a   :  { %v514_v62 = vsel %vm1998_vm4, %v513_v61, %v512_v60 }
 0x69b   :  { %v1483_v63 = vmul.f32 -1.442695, %v514_v62 }
 0x69d   :  { %1551 = vpow2.f32 %v1483_v63 }
 0x6a3   :  { %v1552_v0 = vpop.eup %1551 }
 0x6a4   :  { %v518_v1 = vadd.f32 1.0, %v1552_v0 }
 0x6a6   :  { %1553 = vrcp.f32 %v518_v1  ;;  %v530_v5 = vand.u32 2147483648, %v518_v1  ;;  %v528_v7 = vand.u32 2147483647, %v518_v1  ;;  %vm524_vm11 = vweird.f32 %v518_v1 }
 0x6a8   :  { %v531_v9 = vor.u32 1.1754944e-38, %v530_v5  ;;  %vm529_vm13 = vcmp.eq.f32.partialorder %v528_v7, 8.507059e+37 }
 0x6ac   :  { %v1554_v2 = vpop.eup %1553 }
 0x6ad   :  { %v520_v3 = vmul.f32 %v1554_v2, %v518_v1  ;;  %vm525_vm10 = vweird.f32 %v1554_v2 }
 0x6ae   :  { %vm526_vm12 = vmor %vm524_vm11, %vm525_vm10 }
 0x6af   :  { %v521_v4 = vsub.f32 1.0, %v520_v3 }
 0x6b1   :  { %v522_v6 = vmul.f32 %v1554_v2, %v521_v4 }
 0x6b3   :  { %v523_v8 = vadd.f32 %v1554_v2, %v522_v6 }
 0x6b5   :  { %v527_v23 = vsel %vm526_vm12, %v1554_v2, %v523_v8  ;;  %vm802_vm12 = vcmask 1041408  }
 0x6b6   :  { %v532_v10 = vsel %vm529_vm13, %v531_v9, %v527_v23 }
 0x6b7   :  { %v534_v11 = vadd.f32 %v532_v10, %v532_v10 }
 0x6b9   :  { %v1484_v12 = vadd.f32 -1.0, %v534_v11 }
 0x6bb   :  { %v536_v13 = vsel %vm1998_vm4, %v1484_v12, %v532_v10 }
 0x6bc   :  { %v538_v14 = vrot.slane %v536_v13, 2 }
 0x6be   :  { %544 = vrot.lane.b32.xlu2 %v538_v14, %s1748_s3  ;;  %540 = vrot.lane.b32.xlu1 %v538_v14, %s1749_s30 }
 0x6bf   :  { %542 = vrot.lane.b32.xlu0 %v538_v14, %s1750_s11 }
 0x718   :  { %v545_v27 = vpop.permute.xlu2 %544 }
 0x730   :  { %v541_v17 = vpop.permute.xlu1 %540 }
 0x731   :  { %v543_v15 = vpop.permute.xlu0 %542  ;;  %v546_v19 = vmul.f32 %v541_v17, %v486_v54  ;;  %v2078_v17 = vld [vmem:[#allocation5 + $0xf0] sm:$0xff] }
 0x732   :  { %v548_v16 = vrot.slane %v543_v15, 6  ;;  %694 = vmatpush.msra.mxu1 %v2078_v17  ;;  %751 = vmatpush.msra.mxu2 %v2078_v17 }
 0x733   :  { %859 = vmatpush.msrb.mxu0 %v2078_v17 }
 0x734   :  { %v550_v18 = vmul.f32 %v548_v16, %v536_v13 }
 0x736   :  { %v552_v21 = vrot.slane %v550_v18, 2  ;;  %v2080_v18 = vld [vmem:[#allocation5 + $0xe0] sm:$0xff] }
 0x737   :  { %695 = vmatpush.msra.mxu1 %v2080_v18  ;;  %752 = vmatpush.msra.mxu2 %v2080_v18 }
 0x738   :  { %v554_v24 = vadd.f32 %v552_v21, %v546_v19  ;;  %v2084_v19 = vld [vmem:[#allocation5 + $0xd0] sm:$0xff]  ;;  %v2089_v21 = vld [vmem:[#allocation5 + $0xc0] sm:$0xff]  ;;  %860 = vmatpush.msrb.mxu0 %v2080_v18 }
 0x739   :  { %696 = vmatpush.msra.mxu1 %v2084_v19  ;;  %753 = vmatpush.msra.mxu2 %v2084_v19 }
 0x73a   :  { %1555 = vtanh.f32 %v554_v24  ;;  %861 = vmatpush.msrb.mxu0 %v2084_v19 }
 0x73b   :  { %697 = vmatpush.msra.mxu1 %v2089_v21  ;;  %754 = vmatpush.msra.mxu2 %v2089_v21 }
 0x73c   :  { %862 = vmatpush.msrb.mxu0 %v2089_v21 }
 0x740   :  { %v1556_v25 = vpop.eup %1555 }
 0x741   :  { %v556_v28 = vmul.f32 %v1556_v25, %v545_v27  ;;  %v2099_v25 = vld [vmem:[#allocation5 + $0xa0] sm:$0xff]  ;;  %v2104_v27 = vld [vmem:[#allocation5 + $0x90] sm:$0xff] }
 0x743   :  { %573 = vmatmul.f32.vlgmr.msrb.gmra.mxu3 %v556_v28  ;;  %v2113_v28 = vld [vmem:[#allocation5 + $0x80] sm:$0xff] }
 0x7c6   :  { %v574_v29 = vpop.f32.mrf.mxu3 }
 0x7c7   :  { %v578_v31 = vrot.slane %v574_v29, 4  ;;  %v2117_v29 = vld [vmem:[#allocation5 + $0x70] sm:$0xff] }
 0x7c9   :  { %v580_v32 = vadd.f32 %v578_v31, %v2038_v30  ;;  %v2122_v31 = vld [vmem:[#allocation5 + $0x60] sm:$0xff] }
 0x7cb   :  { %v581_v33 = vadd.f32 %v580_v32, %v580_v32 }
 0x7cd   :  { %v582_v34 = vsel %vm1998_vm4, %v581_v33, %v580_v32  ;;  %v2127_v32 = vld [vmem:[#allocation5 + $0x50] sm:$0xff]  ;;  %v2132_v33 = vld [vmem:[#allocation5 + $0x40] sm:$0xff] }
 0x7ce   :  { %v1485_v35 = vmul.f32 -1.442695, %v582_v34  ;;  %v2136_v34 = vld [vmem:[#allocation5 + $0x30] sm:$0xff] }
 0x7d0   :  { %1557 = vpow2.f32 %v1485_v35  ;;  %v2139_v35 = vld [vmem:[#allocation5 + $0x20] sm:$0xff] }
 0x7d6   :  { %v1558_v36 = vpop.eup %1557 }
 0x7d7   :  { %v586_v37 = vadd.f32 1.0, %v1558_v36  ;;  %v2144_v36 = vld [vmem:[#allocation5 + $0x10] sm:$0xff] }
 0x7d9   :  { %1559 = vrcp.f32 %v586_v37  ;;  %v598_v41 = vand.u32 2147483648, %v586_v37  ;;  %v596_v20 = vand.u32 2147483647, %v586_v37  ;;  %vm592_vm15 = vweird.f32 %v586_v37 }
 0x7db   :  { %v599_v44 = vor.u32 1.1754944e-38, %v598_v41  ;;  %vm597_vm1 = vcmp.eq.f32.partialorder %v596_v20, 8.507059e+37 }
 0x7df   :  { %v1560_v38 = vpop.eup %1559 }
 0x7e0   :  { %v588_v39 = vmul.f32 %v1560_v38, %v586_v37  ;;  %vm593_vm14 = vweird.f32 %v1560_v38  ;;  %v2149_v37 = vld [vmem:[#allocation5] sm:$0xff] }
 0x7e1   :  { %vm594_vm0 = vmor %vm592_vm15, %vm593_vm14 }
 0x7e2   :  { %v589_v40 = vsub.f32 1.0, %v588_v39 }
 0x7e4   :  { %v590_v42 = vmul.f32 %v1560_v38, %v589_v40 }
 0x7e6   :  { %v591_v43 = vadd.f32 %v1560_v38, %v590_v42 }
 0x7e8   :  { %v595_v45 = vsel %vm594_vm0, %v1560_v38, %v591_v43 }
 0x7e9   :  { %v600_v46 = vsel %vm597_vm1, %v599_v44, %v595_v45 }
 0x7ea   :  { %v602_v47 = vadd.f32 %v600_v46, %v600_v46 }
 0x7ec   :  { %v1486_v48 = vadd.f32 -1.0, %v602_v47  ;;  %v2198_v47 = vld [vmem:[%s2529_s6] ss:$0 sm:$0xff] }
 0x7ee   :  { %v604_v49 = vsel %vm1998_vm4, %v1486_v48, %v600_v46  ;;  %v2203_v48 = vld [vmem:[%s2527_s4] ss:$0 sm:$0xff] }
 0x7ef   :  { %v606_v50 = vrot.slane %v604_v49, 4 }
 0x7f1   :  { %612 = vrot.lane.b32.xlu2 %v606_v50, %s1748_s3  ;;  %608 = vrot.lane.b32.xlu1 %v606_v50, %s1749_s30 }
 0x7f2   :  { %610 = vrot.lane.b32.xlu0 %v606_v50, %s1750_s11 }
 0x84b   :  { %v613_v59 = vpop.permute.xlu2 %612 }
 0x863   :  { %v609_v53 = vpop.permute.xlu1 %608 }
 0x864   :  { %v611_v51 = vpop.permute.xlu0 %610  ;;  %v614_v55 = vmul.f32 %v609_v53, %v554_v24  ;;  %v2094_v24 = vld [vmem:[#allocation5 + $0xb0] sm:$0xff] }
 0x865   :  { %v616_v52 = vrot.slane %v611_v51, 4  ;;  %698 = vmatpush.msra.mxu1 %v2094_v24  ;;  %755 = vmatpush.msra.mxu2 %v2094_v24 }
 0x866   :  { %863 = vmatpush.msrb.mxu0 %v2094_v24 }
 0x867   :  { %v618_v54 = vmul.f32 %v616_v52, %v604_v49  ;;  %699 = vmatpush.msra.mxu1 %v2099_v25  ;;  %756 = vmatpush.msra.mxu2 %v2099_v25  ;;  %v714_v49 = vsub.f32 %v2198_v47, %v2203_v48 }
 0x868   :  { %864 = vmatpush.msrb.mxu0 %v2099_v25 }
 0x869   :  { %v620_v56 = vrot.slane %v618_v54, 4  ;;  %700 = vmatpush.msra.mxu1 %v2104_v27  ;;  %757 = vmatpush.msra.mxu2 %v2104_v27 }
 0x86a   :  { %865 = vmatpush.msrb.mxu0 %v2104_v27 }
 0x86b   :  { %v2064_v57 = vadd.f32 %v620_v56, %v614_v55  ;;  %701 = vmatpush.msra.mxu1 %v2113_v28  ;;  %758 = vmatpush.msra.mxu2 %v2113_v28 }
 0x86c   :  { %866 = vmatpush.msrb.mxu0 %v2113_v28 }
 0x86d   :  { %1561 = vtanh.f32 %v2064_v57  ;;  %702 = vmatpush.msra.mxu1 %v2117_v29  ;;  %759 = vmatpush.msra.mxu2 %v2117_v29 }
 0x86e   :  { %867 = vmatpush.msrb.mxu0 %v2117_v29 }
 0x86f   :  { %703 = vmatpush.msra.mxu1 %v2122_v31  ;;  %760 = vmatpush.msra.mxu2 %v2122_v31 }
 0x870   :  { %868 = vmatpush.msrb.mxu0 %v2122_v31 }
 0x871   :  { %704 = vmatpush.msra.mxu1 %v2127_v32  ;;  %761 = vmatpush.msra.mxu2 %v2127_v32 }
 0x872   :  { %869 = vmatpush.msrb.mxu0 %v2127_v32 }
 0x873   :  { %v1562_v58 = vpop.eup %1561  ;;  %705 = vmatpush.msra.mxu1 %v2132_v33  ;;  %762 = vmatpush.msra.mxu2 %v2132_v33 }
 0x874   :  { %v624_v60 = vmul.f32 %v1562_v58, %v613_v59  ;;  %870 = vmatpush.msrb.mxu0 %v2132_v33 }
 0x875   :  { %706 = vmatpush.msra.mxu1 %v2136_v34  ;;  %763 = vmatpush.msra.mxu2 %v2136_v34 }
 0x876   :  { %641 = vmatmul.f32.vlgmr.msra.gmra.mxu0 %v624_v60 }
 0x877   :  { %871 = vmatpush.msrb.mxu0 %v2136_v34  ;;  %707 = vmatpush.msra.mxu1 %v2139_v35 }
 0x878   :  { %764 = vmatpush.msra.mxu2 %v2139_v35 }
 0x879   :  { %872 = vmatpush.msrb.mxu0 %v2139_v35  ;;  %708 = vmatpush.msra.mxu1 %v2144_v36 }
 0x87a   :  { %765 = vmatpush.msra.mxu2 %v2144_v36 }
 0x87b   :  { %873 = vmatpush.msrb.mxu0 %v2144_v36  ;;  %709 = vmatpush.msra.mxu1 %v2149_v37 }
 0x87c   :  { %766 = vmatpush.msra.mxu2 %v2149_v37 }
 0x87d   :  { %874 = vmatpush.msrb.mxu0 %v2149_v37 }
 0x87e   :  { %966 = vmatpush.msrb.mxu2 %v2078_v17 }
 0x87f   :  { %1073 = vmatpush.msra.mxu0 %v2078_v17 }
 0x880   :  { %967 = vmatpush.msrb.mxu2 %v2080_v18 }
 0x881   :  { %1074 = vmatpush.msra.mxu0 %v2080_v18 }
 0x882   :  { %968 = vmatpush.msrb.mxu2 %v2084_v19 }
 0x883   :  { %1075 = vmatpush.msra.mxu0 %v2084_v19 }
 0x884   :  { %969 = vmatpush.msrb.mxu2 %v2089_v21 }
 0x885   :  { %1076 = vmatpush.msra.mxu0 %v2089_v21 }
 0x886   :  { %970 = vmatpush.msrb.mxu2 %v2094_v24 }
 0x887   :  { %1077 = vmatpush.msra.mxu0 %v2094_v24 }
 0x888   :  { %971 = vmatpush.msrb.mxu2 %v2099_v25 }
 0x889   :  { %1078 = vmatpush.msra.mxu0 %v2099_v25 }
 0x88a   :  { %972 = vmatpush.msrb.mxu2 %v2104_v27 }
 0x88b   :  { %1079 = vmatpush.msra.mxu0 %v2104_v27 }
 0x88c   :  { %973 = vmatpush.msrb.mxu2 %v2113_v28 }
 0x88d   :  { %1080 = vmatpush.msra.mxu0 %v2113_v28 }
 0x88e   :  { %974 = vmatpush.msrb.mxu2 %v2117_v29 }
 0x88f   :  { %1081 = vmatpush.msra.mxu0 %v2117_v29 }
 0x890   :  { %975 = vmatpush.msrb.mxu2 %v2122_v31 }
 0x891   :  { %1082 = vmatpush.msra.mxu0 %v2122_v31 }
 0x892   :  { %976 = vmatpush.msrb.mxu2 %v2127_v32 }
 0x893   :  { %1083 = vmatpush.msra.mxu0 %v2127_v32 }
 0x894   :  { %977 = vmatpush.msrb.mxu2 %v2132_v33 }
 0x895   :  { %1084 = vmatpush.msra.mxu0 %v2132_v33 }
 0x896   :  { %978 = vmatpush.msrb.mxu2 %v2136_v34 }
 0x897   :  { %1085 = vmatpush.msra.mxu0 %v2136_v34 }
 0x898   :  { %979 = vmatpush.msrb.mxu2 %v2139_v35 }
 0x899   :  { %1086 = vmatpush.msra.mxu0 %v2139_v35 }
 0x89a   :  { %980 = vmatpush.msrb.mxu2 %v2144_v36 }
 0x89b   :  { %1087 = vmatpush.msra.mxu0 %v2144_v36 }
 0x89c   :  { %981 = vmatpush.msrb.mxu2 %v2149_v37 }
 0x89d   :  { %1088 = vmatpush.msra.mxu0 %v2149_v37 }
 0x8f3   :  { %v642_v61 = vpop.f32.mrf.mxu0 }
 0x8f4   :  { %v646_v62 = vrot.slane %v642_v61, 2 }
 0x8f6   :  { %v648_v63 = vadd.f32 %v646_v62, %v2038_v30 }
 0x8f8   :  { %v649_v0 = vadd.f32 %v648_v63, %v648_v63 }
 0x8fa   :  { %v650_v1 = vsel %vm1998_vm4, %v649_v0, %v648_v63 }
 0x8fb   :  { %v1487_v2 = vmul.f32 -1.442695, %v650_v1 }
 0x8fd   :  { %1563 = vpow2.f32 %v1487_v2 }
 0x903   :  { %v1564_v3 = vpop.eup %1563 }
 0x904   :  { %v654_v4 = vadd.f32 1.0, %v1564_v3 }
 0x906   :  { %1565 = vrcp.f32 %v654_v4  ;;  %v666_v8 = vand.u32 2147483648, %v654_v4  ;;  %v664_v23 = vand.u32 2147483647, %v654_v4  ;;  %vm660_vm3 = vweird.f32 %v654_v4 }
 0x908   :  { %v667_v30 = vor.u32 1.1754944e-38, %v666_v8  ;;  %vm665_vm6 = vcmp.eq.f32.partialorder %v664_v23, 8.507059e+37  ;;  %v2225_v8 = vld [vmem:[#allocation5 + $0xd8] sm:$0xff] }
 0x909   :  { %v2233_v23 = vld [vmem:[#allocation5 + $0xb8] sm:$0xff] }
 0x90c   :  { %v1566_v5 = vpop.eup %1565 }
 0x90d   :  { %v656_v6 = vmul.f32 %v1566_v5, %v654_v4  ;;  %vm661_vm2 = vweird.f32 %v1566_v5 }
 0x90e   :  { %vm662_vm5 = vmor %vm660_vm3, %vm661_vm2 }
 0x90f   :  { %v657_v7 = vsub.f32 1.0, %v656_v6  ;;  %v2219_v6 = vld [vmem:[#allocation5 + $0xf8] sm:$0xff] }
 0x910   :  { %771 = vmatpush.msra.mxu3 %v2219_v6  ;;  %879 = vmatpush.msrb.mxu1 %v2219_v6 }
 0x911   :  { %v658_v9 = vmul.f32 %v1566_v5, %v657_v7  ;;  %v2221_v7 = vld [vmem:[#allocation5 + $0xe8] sm:$0xff] }
 0x912   :  { %772 = vmatpush.msra.mxu3 %v2221_v7  ;;  %880 = vmatpush.msrb.mxu1 %v2221_v7 }
 0x913   :  { %v659_v10 = vadd.f32 %v1566_v5, %v658_v9  ;;  %v2229_v9 = vld [vmem:[#allocation5 + $0xc8] sm:$0xff] }
 0x914   :  { %773 = vmatpush.msra.mxu3 %v2225_v8  ;;  %881 = vmatpush.msrb.mxu1 %v2225_v8 }
 0x915   :  { %v663_v11 = vsel %vm662_vm5, %v1566_v5, %v659_v10  ;;  %v2237_v10 = vld [vmem:[#allocation5 + $0xa8] sm:$0xff] }
 0x916   :  { %v668_v12 = vsel %vm665_vm6, %v667_v30, %v663_v11  ;;  %774 = vmatpush.msra.mxu3 %v2229_v9  ;;  %882 = vmatpush.msrb.mxu1 %v2229_v9  ;;  %v2241_v30 = vld [vmem:[#allocation5 + $0x98] sm:$0xff]  ;;  %v2245_v11 = vld [vmem:[#allocation5 + $0x88] sm:$0xff] }
 0x917   :  { %v670_v13 = vadd.f32 %v668_v12, %v668_v12 }
 0x918   :  { %775 = vmatpush.msra.mxu3 %v2233_v23  ;;  %883 = vmatpush.msrb.mxu1 %v2233_v23 }
 0x919   :  { %v1488_v14 = vadd.f32 -1.0, %v670_v13  ;;  %v2255_v13 = vld [vmem:[#allocation5 + $0x68] sm:$0xff] }
 0x91a   :  { %776 = vmatpush.msra.mxu3 %v2237_v10  ;;  %884 = vmatpush.msrb.mxu1 %v2237_v10 }
 0x91b   :  { %v2072_v15 = vsel %vm1998_vm4, %v1488_v14, %v668_v12  ;;  %v2249_v12 = vld [vmem:[#allocation5 + $0x78] sm:$0xff] }
 0x91c   :  { %v674_v16 = vrot.slane %v2072_v15, 6  ;;  %777 = vmatpush.msra.mxu3 %v2241_v30  ;;  %885 = vmatpush.msrb.mxu1 %v2241_v30  ;;  %v2259_v14 = vld [vmem:[#allocation5 + $0x58] sm:$0xff] }
 0x91e   :  { %680 = vrot.lane.b32.xlu2 %v674_v16, %s1748_s3  ;;  %676 = vrot.lane.b32.xlu1 %v674_v16, %s1749_s30 }
 0x91f   :  { %678 = vrot.lane.b32.xlu0 %v674_v16, %s1750_s11  ;;  %778 = vmatpush.msra.mxu3 %v2245_v11  ;;  %v2266_v16 = vld [vmem:[#allocation5 + $0x38] sm:$0xff] }
 0x920   :  { %886 = vmatpush.msrb.mxu1 %v2245_v11 }
 0x921   :  { %779 = vmatpush.msra.mxu3 %v2249_v12 }
 0x922   :  { %887 = vmatpush.msrb.mxu1 %v2249_v12 }
 0x923   :  { %780 = vmatpush.msra.mxu3 %v2255_v13 }
 0x924   :  { %888 = vmatpush.msrb.mxu1 %v2255_v13 }
 0x925   :  { %781 = vmatpush.msra.mxu3 %v2259_v14 }
 0x926   :  { %889 = vmatpush.msrb.mxu1 %v2259_v14 }
 0x978   :  { %v681_v45 = vpop.permute.xlu2 %680 }
 0x990   :  { %v677_v40 = vpop.permute.xlu1 %676 }
 0x991   :  { %v679_v38 = vpop.permute.xlu0 %678  ;;  %v682_v42 = vmul.f32 %v677_v40, %v2064_v57  ;;  %v2277_v40 = vld [vmem:[#allocation5 + $0x8] sm:$0xff] }
 0x992   :  { %v684_v39 = vrot.slane %v679_v38, 2  ;;  %v2269_v38 = vld [vmem:[#allocation5 + $0x28] sm:$0xff] }
 0x994   :  { %v686_v41 = vmul.f32 %v684_v39, %v2072_v15  ;;  %v2263_v15 = vld [vmem:[#allocation5 + $0x48] sm:$0xff]  ;;  %v2273_v39 = vld [vmem:[#allocation5 + $0x18] sm:$0xff] }
 0x995   :  { %782 = vmatpush.msra.mxu3 %v2263_v15  ;;  %890 = vmatpush.msrb.mxu1 %v2263_v15 }
 0x996   :  { %v688_v20 = vrot.slane %v686_v41, 6 }
 0x997   :  { %783 = vmatpush.msra.mxu3 %v2266_v16  ;;  %891 = vmatpush.msrb.mxu1 %v2266_v16 }
 0x998   :  { %v2181_v43 = vadd.f32 %v688_v20, %v682_v42 }
 0x999   :  { %784 = vmatpush.msra.mxu3 %v2269_v38  ;;  %892 = vmatpush.msrb.mxu1 %v2269_v38 }
 0x99a   :  { %1567 = vtanh.f32 %v2181_v43 }
 0x99b   :  { %785 = vmatpush.msra.mxu3 %v2273_v39  ;;  %893 = vmatpush.msrb.mxu1 %v2273_v39 }
 0x99d   :  { %786 = vmatpush.msra.mxu3 %v2277_v40  ;;  %894 = vmatpush.msrb.mxu1 %v2277_v40 }
 0x99f   :  { %986 = vmatpush.msrb.mxu3 %v2219_v6 }
 0x9a0   :  { %v1568_v44 = vpop.eup %1567 }
 0x9a1   :  { %v692_v46 = vmul.f32 %v1568_v44, %v681_v45  ;;  %987 = vmatpush.msrb.mxu3 %v2221_v7 }
 0x9a3   :  { %710 = vmatmul.f32.vlgmr.msra.gmra.mxu1 %v692_v46  ;;  %988 = vmatpush.msrb.mxu3 %v2225_v8 }
 0x9a4   :  { %1093 = vmatpush.msra.mxu1 %v2219_v6 }
 0x9a5   :  { %989 = vmatpush.msrb.mxu3 %v2229_v9 }
 0x9a6   :  { %1094 = vmatpush.msra.mxu1 %v2221_v7 }
 0x9a7   :  { %990 = vmatpush.msrb.mxu3 %v2233_v23 }
 0x9a8   :  { %1095 = vmatpush.msra.mxu1 %v2225_v8 }
 0x9a9   :  { %991 = vmatpush.msrb.mxu3 %v2237_v10 }
 0x9aa   :  { %1096 = vmatpush.msra.mxu1 %v2229_v9 }
 0x9ab   :  { %992 = vmatpush.msrb.mxu3 %v2241_v30 }
 0x9ac   :  { %1097 = vmatpush.msra.mxu1 %v2233_v23 }
 0x9ad   :  { %993 = vmatpush.msrb.mxu3 %v2245_v11 }
 0x9ae   :  { %1098 = vmatpush.msra.mxu1 %v2237_v10 }
 0x9af   :  { %994 = vmatpush.msrb.mxu3 %v2249_v12 }
 0x9b0   :  { %1099 = vmatpush.msra.mxu1 %v2241_v30 }
 0x9b1   :  { %995 = vmatpush.msrb.mxu3 %v2255_v13 }
 0x9b2   :  { %1100 = vmatpush.msra.mxu1 %v2245_v11 }
 0x9b3   :  { %996 = vmatpush.msrb.mxu3 %v2259_v14 }
 0x9b4   :  { %1101 = vmatpush.msra.mxu1 %v2249_v12 }
 0x9b5   :  { %997 = vmatpush.msrb.mxu3 %v2263_v15 }
 0x9b6   :  { %1102 = vmatpush.msra.mxu1 %v2255_v13 }
 0x9b7   :  { %998 = vmatpush.msrb.mxu3 %v2266_v16 }
 0x9b8   :  { %1103 = vmatpush.msra.mxu1 %v2259_v14 }
 0x9b9   :  { %999 = vmatpush.msrb.mxu3 %v2269_v38 }
 0x9ba   :  { %1104 = vmatpush.msra.mxu1 %v2263_v15 }
 0x9bb   :  { %1000 = vmatpush.msrb.mxu3 %v2273_v39 }
 0x9bc   :  { %1105 = vmatpush.msra.mxu1 %v2266_v16 }
 0x9bd   :  { %1001 = vmatpush.msrb.mxu3 %v2277_v40 }
 0x9be   :  { %1106 = vmatpush.msra.mxu1 %v2269_v38 }
 0x9c0   :  { %1107 = vmatpush.msra.mxu1 %v2273_v39 }
 0x9c2   :  { %1108 = vmatpush.msra.mxu1 %v2277_v40 }
 0xa20   :  { %v711_v50 = vpop.f32.mrf.mxu1 }
 0xa21   :  { %v715_v51 = vadd.f32 %v714_v49, %v711_v50  ;;  %v2355_v50 = vld [vmem:[%s2530_s7] ss:$0 sm:$0xff] }
 0xa23   :  { %v716_v52 = vadd.f32 %v715_v51, %v715_v51 }
 0xa25   :  { %v717_v53 = vsel %vm1998_vm4, %v716_v52, %v715_v51 }
 0xa26   :  { %v1489_v54 = vmul.f32 -1.442695, %v717_v53 }
 0xa28   :  { %1569 = vpow2.f32 %v1489_v54 }
 0xa2e   :  { %v1570_v55 = vpop.eup %1569 }
 0xa2f   :  { %v721_v56 = vadd.f32 1.0, %v1570_v55 }
 0xa31   :  { %1571 = vrcp.f32 %v721_v56  ;;  %v733_v60 = vand.u32 2147483648, %v721_v56  ;;  %v731_v62 = vand.u32 2147483647, %v721_v56  ;;  %vm727_vm8 = vweird.f32 %v721_v56 }
 0xa33   :  { %v734_v0 = vor.u32 1.1754944e-38, %v733_v60  ;;  %vm732_vm10 = vcmp.eq.f32.partialorder %v731_v62, 8.507059e+37 }
 0xa37   :  { %v1572_v57 = vpop.eup %1571 }
 0xa38   :  { %v723_v58 = vmul.f32 %v1572_v57, %v721_v56  ;;  %vm728_vm7 = vweird.f32 %v1572_v57  ;;  %v2359_v56 = vsub.s32 127, %v1990_v22 }
 0xa39   :  { %vm729_vm9 = vmor %vm727_vm8, %vm728_vm7 }
 0xa3a   :  { %v724_v59 = vsub.f32 1.0, %v723_v58 }
 0xa3c   :  { %v725_v61 = vmul.f32 %v1572_v57, %v724_v59 }
 0xa3e   :  { %v726_v63 = vadd.f32 %v1572_v57, %v725_v61 }
 0xa40   :  { %v730_v1 = vsel %vm729_vm9, %v1572_v57, %v726_v63 }
 0xa41   :  { %v735_v2 = vsel %vm732_vm10, %v734_v0, %v730_v1 }
 0xa42   :  { %v737_v3 = vadd.f32 %v735_v2, %v735_v2 }
 0xa44   :  { %v1490_v4 = vadd.f32 -1.0, %v737_v3 }
 0xa46   :  { %v2211_v5 = vsel %vm1998_vm4, %v1490_v4, %v735_v2 }
 0xa47   :  { %744 = vrot.lane.b32.xlu2 %v2211_v5, %s1748_s3  ;;  %742 = vrot.lane.b32.xlu1 %v2211_v5, %s1750_s11 }
 0xa48   :  { %740 = vrot.lane.b32.xlu0 %v2211_v5, %s1749_s30 }
 0xaa1   :  { %v745_v46 = vpop.permute.xlu2 %744 }
 0xab9   :  { %v743_v41 = vpop.permute.xlu1 %742 }
 0xaba   :  { %v747_v42 = vmul.f32 %v743_v41, %v2211_v5  ;;  %v741_v20 = vpop.permute.xlu0 %740 }
 0xabb   :  { %v746_v44 = vmul.f32 %v741_v20, %v2181_v43 }
 0xabd   :  { %v2307_v45 = vadd.f32 %v747_v42, %v746_v44 }
 0xabf   :  { %1573 = vtanh.f32 %v2307_v45 }
 0xac5   :  { %v1574_v43 = vpop.eup %1573 }
 0xac6   :  { %v750_v49 = vmul.f32 %v1574_v43, %v745_v46 }
 0xac8   :  { %767 = vmatmul.f32.vlgmr.msra.gmra.mxu2 %v750_v49  ;;  %787 = vmatmul.f32.vlgmr.msra.gmra.mxu3 %v750_v49 }
 0xac9   :  { %1180 = vmatpush.msra.mxu2 %v2078_v17  ;;  %1200 = vmatpush.msra.mxu3 %v2219_v6 }
 0xacb   :  { %1181 = vmatpush.msra.mxu2 %v2080_v18  ;;  %1201 = vmatpush.msra.mxu3 %v2221_v7 }
 0xacd   :  { %1182 = vmatpush.msra.mxu2 %v2084_v19  ;;  %1202 = vmatpush.msra.mxu3 %v2225_v8 }
 0xacf   :  { %1183 = vmatpush.msra.mxu2 %v2089_v21  ;;  %1203 = vmatpush.msra.mxu3 %v2229_v9 }
 0xad1   :  { %1184 = vmatpush.msra.mxu2 %v2094_v24  ;;  %1204 = vmatpush.msra.mxu3 %v2233_v23 }
 0xad3   :  { %1185 = vmatpush.msra.mxu2 %v2099_v25  ;;  %1205 = vmatpush.msra.mxu3 %v2237_v10 }
 0xad5   :  { %1186 = vmatpush.msra.mxu2 %v2104_v27  ;;  %1206 = vmatpush.msra.mxu3 %v2241_v30 }
 0xad7   :  { %1187 = vmatpush.msra.mxu2 %v2113_v28  ;;  %1207 = vmatpush.msra.mxu3 %v2245_v11 }
 0xad9   :  { %1188 = vmatpush.msra.mxu2 %v2117_v29  ;;  %1208 = vmatpush.msra.mxu3 %v2249_v12 }
 0xadb   :  { %1189 = vmatpush.msra.mxu2 %v2122_v31  ;;  %1209 = vmatpush.msra.mxu3 %v2255_v13 }
 0xadd   :  { %1190 = vmatpush.msra.mxu2 %v2127_v32  ;;  %1210 = vmatpush.msra.mxu3 %v2259_v14 }
 0xadf   :  { %1191 = vmatpush.msra.mxu2 %v2132_v33  ;;  %1211 = vmatpush.msra.mxu3 %v2263_v15 }
 0xae1   :  { %1192 = vmatpush.msra.mxu2 %v2136_v34  ;;  %1212 = vmatpush.msra.mxu3 %v2266_v16 }
 0xae3   :  { %1193 = vmatpush.msra.mxu2 %v2139_v35  ;;  %1213 = vmatpush.msra.mxu3 %v2269_v38 }
 0xae5   :  { %1194 = vmatpush.msra.mxu2 %v2144_v36  ;;  %1214 = vmatpush.msra.mxu3 %v2273_v39 }
 0xae7   :  { %1195 = vmatpush.msra.mxu2 %v2149_v37  ;;  %1215 = vmatpush.msra.mxu3 %v2277_v40 }
 0xb4b   :  { %v788_v51 = vpop.f32.mrf.mxu3  ;;  %v768_v49 = vpop.f32.mrf.mxu2 }
 0xb4c   :  { %v791_v52 = vadd.f32 %v2355_v50, %v788_v51 }
 0xb4e   :  { %793 = vst [vmem:[#allocation7 + $0x2] sm:$0x3] %v791_v52  ;;  %v796_v53 = vand.u32 2147483647, %v791_v52  ;;  %vm795_vm11 = vcmp.ge.s32.totalorder %v791_v52, 0 }
 0xb50   :  { %v797_v54 = vsub.s32 0, %v796_v53 }
 0xb52   :  { %v798_v55 = vsel %vm795_vm11, %v791_v52, %v797_v54 }
 0xb53   :  { %v799_v57 = vshra.s32 %v798_v55, 7 }
 0xb55   :  { %v800_v58 = vshll.u32 %v799_v57, 7 }
 0xb57   :  { %v801_v59 = vor.u32 %v800_v58, %v2359_v56 }
 0xb59   :  { %v803_v60 = vsel %vm802_vm12, %v801_v59, 2147483648 }
 0xb5a   :  { %v805_v61 = vshra.s32 %v803_v60, 16  ;;  %v804_v63 = vand.u32 65535, %v803_v60 }
 0xb5c   :  { %v807_v62 = vcvt.s32.f32 %v805_v61  ;;  %v806_v1 = vcvt.s32.f32 %v804_v63 }
 0xb5e   :  { %808 = vmax.xlane.f32.xlu0 %v807_v62 }
 0xbd1   :  { %v809_v0 = vpop.xlane.xlu0 %808 }
 0xbd2   :  { %vm810_vm13 = vcmp.eq.f32.partialorder %v807_v62, %v809_v0  ;;  %v815_v3 = vcvt.f32.s32 %v809_v0 }
 0xbd3   :  { %v811_v2 = vsel %vm810_vm13, %v806_v1, -inf }
 0xbd4   :  { %812 = vmax.xlane.f32.xlu1 %v811_v2  ;;  %v816_v22 = vshll.u32 %v815_v3, 16 }
 0xc47   :  { %v813_v4 = vpop.xlane.xlu1 %812 }
 0xc48   :  { %v814_v5 = vcvt.f32.s32 %v813_v4 }
 0xc4a   :  { %v817_v41 = vadd.s32 %v816_v22, %v814_v5 }
 0xc4c   :  { %v818_v42 = vand.u32 127, %v817_v41 }
 0xc4e   :  { %v819_v20 = vsub.s32 127, %v818_v42 }
 0xc50   :  { %v820_v44 = vcvt.s32.f32 %v819_v20 }
 0xc52   :  { %v821_v43 = vmul.f32 %v2203_v48, %v820_v44 }
 0xc54   :  { %v822_v46 = vadd.f32 %v2198_v47, %v821_v43 }
 0xc56   :  { %v823_v51 = vadd.f32 %v822_v46, %v768_v49 }
 0xc58   :  { %v824_v52 = vadd.f32 %v823_v51, %v823_v51 }
 0xc5a   :  { %v825_v53 = vsel %vm1998_vm4, %v824_v52, %v823_v51 }
 0xc5b   :  { %v1491_v54 = vmul.f32 -1.442695, %v825_v53 }
 0xc5d   :  { %1575 = vpow2.f32 %v1491_v54 }
 0xc63   :  { %v1576_v55 = vpop.eup %1575 }
 0xc64   :  { %v829_v57 = vadd.f32 1.0, %v1576_v55 }
 0xc66   :  { %1577 = vrcp.f32 %v829_v57  ;;  %v841_v61 = vand.u32 2147483648, %v829_v57  ;;  %v839_v63 = vand.u32 2147483647, %v829_v57  ;;  %vm835_vm15 = vweird.f32 %v829_v57 }
 0xc68   :  { %v842_v1 = vor.u32 1.1754944e-38, %v841_v61  ;;  %vm840_vm1 = vcmp.eq.f32.partialorder %v839_v63, 8.507059e+37 }
 0xc6c   :  { %v1578_v58 = vpop.eup %1577 }
 0xc6d   :  { %v831_v59 = vmul.f32 %v1578_v58, %v829_v57  ;;  %vm836_vm14 = vweird.f32 %v1578_v58 }
 0xc6e   :  { %vm837_vm0 = vmor %vm835_vm15, %vm836_vm14 }
 0xc6f   :  { %v832_v60 = vsub.f32 1.0, %v831_v59 }
 0xc71   :  { %v833_v62 = vmul.f32 %v1578_v58, %v832_v60 }
 0xc73   :  { %v834_v0 = vadd.f32 %v1578_v58, %v833_v62 }
 0xc75   :  { %v838_v2 = vsel %vm837_vm0, %v1578_v58, %v834_v0 }
 0xc76   :  { %v843_v3 = vsel %vm840_vm1, %v842_v1, %v838_v2 }
 0xc77   :  { %v845_v4 = vadd.f32 %v843_v3, %v843_v3 }
 0xc79   :  { %v1492_v22 = vadd.f32 -1.0, %v845_v4 }
 0xc7b   :  { %v847_v5 = vsel %vm1998_vm4, %v1492_v22, %v843_v3 }
 0xc7c   :  { %848 = vrot.lane.b32.xlu2 %v847_v5, %s1749_s30 }
 0xc84   :  { %850 = vrot.lane.b32.xlu2 %v847_v5, %s1750_s11 }
 0xc8c   :  { %852 = vrot.lane.b32.xlu2 %v847_v5, %s1748_s3 }
 0xcd6   :  { %v849_v41 = vpop.permute.xlu2 %848 }
 0xcd7   :  { %v854_v20 = vmul.f32 %v849_v41, %v2307_v45 }
 0xcde   :  { %v851_v42 = vpop.permute.xlu2 %850 }
 0xcdf   :  { %v855_v44 = vmul.f32 %v851_v42, %v847_v5 }
 0xce1   :  { %v2373_v43 = vadd.f32 %v855_v44, %v854_v20 }
 0xce3   :  { %1579 = vtanh.f32 %v2373_v43 }
 0xce6   :  { %v853_v49 = vpop.permute.xlu2 %852 }
 0xce9   :  { %v1580_v46 = vpop.eup %1579 }
 0xcea   :  { %v858_v51 = vmul.f32 %v1580_v46, %v853_v49 }
 0xcec   :  { %875 = vmatmul.f32.vlgmr.msrb.gmra.mxu0 %v858_v51  ;;  %895 = vmatmul.f32.vlgmr.msrb.gmra.mxu1 %v858_v51 }
 0xced   :  { %1287 = vmatpush.msrb.mxu0 %v2078_v17  ;;  %1307 = vmatpush.msrb.mxu1 %v2219_v6 }
 0xcef   :  { %1288 = vmatpush.msrb.mxu0 %v2080_v18  ;;  %1308 = vmatpush.msrb.mxu1 %v2221_v7 }
 0xcf1   :  { %1289 = vmatpush.msrb.mxu0 %v2084_v19  ;;  %1309 = vmatpush.msrb.mxu1 %v2225_v8 }
 0xcf3   :  { %1290 = vmatpush.msrb.mxu0 %v2089_v21  ;;  %1310 = vmatpush.msrb.mxu1 %v2229_v9 }
 0xcf5   :  { %1291 = vmatpush.msrb.mxu0 %v2094_v24  ;;  %1311 = vmatpush.msrb.mxu1 %v2233_v23 }
 0xcf7   :  { %1292 = vmatpush.msrb.mxu0 %v2099_v25  ;;  %1312 = vmatpush.msrb.mxu1 %v2237_v10 }
 0xcf9   :  { %1293 = vmatpush.msrb.mxu0 %v2104_v27  ;;  %1313 = vmatpush.msrb.mxu1 %v2241_v30 }
 0xcfb   :  { %1294 = vmatpush.msrb.mxu0 %v2113_v28  ;;  %1314 = vmatpush.msrb.mxu1 %v2245_v11 }
 0xcfd   :  { %1295 = vmatpush.msrb.mxu0 %v2117_v29  ;;  %1315 = vmatpush.msrb.mxu1 %v2249_v12 }
 0xcff   :  { %1296 = vmatpush.msrb.mxu0 %v2122_v31  ;;  %1316 = vmatpush.msrb.mxu1 %v2255_v13 }
 0xd01   :  { %1297 = vmatpush.msrb.mxu0 %v2127_v32  ;;  %1317 = vmatpush.msrb.mxu1 %v2259_v14 }
 0xd03   :  { %1298 = vmatpush.msrb.mxu0 %v2132_v33  ;;  %1318 = vmatpush.msrb.mxu1 %v2263_v15 }
 0xd05   :  { %1299 = vmatpush.msrb.mxu0 %v2136_v34  ;;  %1319 = vmatpush.msrb.mxu1 %v2266_v16 }
 0xd07   :  { %1300 = vmatpush.msrb.mxu0 %v2139_v35  ;;  %1320 = vmatpush.msrb.mxu1 %v2269_v38 }
 0xd09   :  { %1301 = vmatpush.msrb.mxu0 %v2144_v36  ;;  %1321 = vmatpush.msrb.mxu1 %v2273_v39 }
 0xd0b   :  { %1302 = vmatpush.msrb.mxu0 %v2149_v37  ;;  %1322 = vmatpush.msrb.mxu1 %v2277_v40 }
 0xd69   :  { %v896_v17 = vpop.f32.mrf.mxu1  ;;  %v876_v61 = vpop.f32.mrf.mxu0 }
 0xd6a   :  { %v899_v18 = vadd.f32 %v2355_v50, %v896_v17 }
 0xd6c   :  { %901 = vst [vmem:[#allocation7 + $0x4] sm:$0x3] %v899_v18  ;;  %v904_v19 = vand.u32 2147483647, %v899_v18  ;;  %vm903_vm2 = vcmp.ge.s32.totalorder %v899_v18, 0 }
 0xd6e   :  { %v905_v21 = vsub.s32 0, %v904_v19 }
 0xd70   :  { %v906_v24 = vsel %vm903_vm2, %v899_v18, %v905_v21 }
 0xd71   :  { %v907_v25 = vshra.s32 %v906_v24, 7 }
 0xd73   :  { %v908_v27 = vshll.u32 %v907_v25, 7 }
 0xd75   :  { %v909_v28 = vor.u32 %v908_v27, %v2359_v56 }
 0xd77   :  { %v910_v29 = vsel %vm802_vm12, %v909_v28, 2147483648 }
 0xd78   :  { %v912_v31 = vshra.s32 %v910_v29, 16  ;;  %v911_v33 = vand.u32 65535, %v910_v29 }
 0xd7a   :  { %v914_v32 = vcvt.s32.f32 %v912_v31  ;;  %v913_v35 = vcvt.s32.f32 %v911_v33 }
 0xd7c   :  { %915 = vmax.xlane.f32.xlu2 %v914_v32 }
 0xdef   :  { %v916_v34 = vpop.xlane.xlu2 %915 }
 0xdf0   :  { %vm917_vm3 = vcmp.eq.f32.partialorder %v914_v32, %v916_v34  ;;  %v922_v37 = vcvt.f32.s32 %v916_v34 }
 0xdf1   :  { %v918_v36 = vsel %vm917_vm3, %v913_v35, -inf }
 0xdf2   :  { %919 = vmax.xlane.f32.xlu0 %v918_v36  ;;  %v923_v52 = vshll.u32 %v922_v37, 16 }
 0xe65   :  { %v920_v45 = vpop.xlane.xlu0 %919 }
 0xe66   :  { %v921_v53 = vcvt.f32.s32 %v920_v45 }
 0xe68   :  { %v924_v54 = vadd.s32 %v923_v52, %v921_v53 }
 0xe6a   :  { %v925_v55 = vand.u32 127, %v924_v54 }
 0xe6c   :  { %v926_v57 = vsub.s32 127, %v925_v55 }
 0xe6e   :  { %v927_v58 = vcvt.s32.f32 %v926_v57 }
 0xe70   :  { %v928_v59 = vmul.f32 %v2203_v48, %v927_v58 }
 0xe72   :  { %v929_v60 = vadd.f32 %v2198_v47, %v928_v59 }
 0xe74   :  { %v930_v62 = vadd.f32 %v929_v60, %v876_v61 }
 0xe76   :  { %v931_v63 = vadd.f32 %v930_v62, %v930_v62 }
 0xe78   :  { %v932_v0 = vsel %vm1998_vm4, %v931_v63, %v930_v62 }
 0xe79   :  { %v1493_v1 = vmul.f32 -1.442695, %v932_v0 }
 0xe7b   :  { %1581 = vpow2.f32 %v1493_v1 }
 0xe81   :  { %v1582_v2 = vpop.eup %1581 }
 0xe82   :  { %v936_v3 = vadd.f32 1.0, %v1582_v2 }
 0xe84   :  { %1583 = vrcp.f32 %v936_v3  ;;  %v948_v41 = vand.u32 2147483648, %v936_v3  ;;  %v946_v20 = vand.u32 2147483647, %v936_v3  ;;  %vm942_vm6 = vweird.f32 %v936_v3 }
 0xe86   :  { %v949_v46 = vor.u32 1.1754944e-38, %v948_v41  ;;  %vm947_vm8 = vcmp.eq.f32.partialorder %v946_v20, 8.507059e+37 }
 0xe8a   :  { %v1584_v4 = vpop.eup %1583 }
 0xe8b   :  { %v938_v22 = vmul.f32 %v1584_v4, %v936_v3  ;;  %vm943_vm5 = vweird.f32 %v1584_v4 }
 0xe8c   :  { %vm944_vm7 = vmor %vm942_vm6, %vm943_vm5 }
 0xe8d   :  { %v939_v5 = vsub.f32 1.0, %v938_v22 }
 0xe8f   :  { %v940_v42 = vmul.f32 %v1584_v4, %v939_v5 }
 0xe91   :  { %v941_v44 = vadd.f32 %v1584_v4, %v940_v42 }
 0xe93   :  { %v945_v49 = vsel %vm944_vm7, %v1584_v4, %v941_v44 }
 0xe94   :  { %v950_v51 = vsel %vm947_vm8, %v949_v46, %v945_v49 }
 0xe95   :  { %v952_v17 = vadd.f32 %v950_v51, %v950_v51 }
 0xe97   :  { %v1494_v18 = vadd.f32 -1.0, %v952_v17 }
 0xe99   :  { %v954_v19 = vsel %vm1998_vm4, %v1494_v18, %v950_v51 }
 0xe9a   :  { %959 = vrot.lane.b32.xlu2 %v954_v19, %s1748_s3  ;;  %957 = vrot.lane.b32.xlu0 %v954_v19, %s1750_s11 }
 0xe9b   :  { %955 = vrot.lane.b32.xlu1 %v954_v19, %s1749_s30 }
 0xef4   :  { %v960_v31 = vpop.permute.xlu2 %959 }
 0xf0c   :  { %v958_v21 = vpop.permute.xlu0 %957 }
 0xf0d   :  { %v962_v24 = vmul.f32 %v958_v21, %v954_v19  ;;  %v956_v25 = vpop.permute.xlu1 %955 }
 0xf0e   :  { %v961_v27 = vmul.f32 %v956_v25, %v2373_v43 }
 0xf10   :  { %v2421_v28 = vadd.f32 %v962_v24, %v961_v27 }
 0xf12   :  { %1585 = vtanh.f32 %v2421_v28 }
 0xf18   :  { %v1586_v29 = vpop.eup %1585 }
 0xf19   :  { %v965_v32 = vmul.f32 %v1586_v29, %v960_v31 }
 0xf1b   :  { %982 = vmatmul.f32.vlgmr.msrb.gmra.mxu2 %v965_v32  ;;  %1002 = vmatmul.f32.vlgmr.msrb.gmra.mxu3 %v965_v32 }
 0xf1c   :  { %1394 = vmatpush.msrb.mxu2 %v2219_v6 }
 0xf1e   :  { %1395 = vmatpush.msrb.mxu2 %v2221_v7 }
 0xf20   :  { %1396 = vmatpush.msrb.mxu2 %v2225_v8 }
 0xf22   :  { %1397 = vmatpush.msrb.mxu2 %v2229_v9 }
 0xf24   :  { %1398 = vmatpush.msrb.mxu2 %v2233_v23 }
 0xf26   :  { %1399 = vmatpush.msrb.mxu2 %v2237_v10 }
 0xf28   :  { %1400 = vmatpush.msrb.mxu2 %v2241_v30 }
 0xf2a   :  { %1401 = vmatpush.msrb.mxu2 %v2245_v11 }
 0xf2c   :  { %1402 = vmatpush.msrb.mxu2 %v2249_v12 }
 0xf2e   :  { %1403 = vmatpush.msrb.mxu2 %v2255_v13 }
 0xf30   :  { %1404 = vmatpush.msrb.mxu2 %v2259_v14 }
 0xf32   :  { %1405 = vmatpush.msrb.mxu2 %v2263_v15 }
 0xf34   :  { %1406 = vmatpush.msrb.mxu2 %v2266_v16 }
 0xf36   :  { %1407 = vmatpush.msrb.mxu2 %v2269_v38 }
 0xf38   :  { %1408 = vmatpush.msrb.mxu2 %v2273_v39 }
 0xf3a   :  { %1409 = vmatpush.msrb.mxu2 %v2277_v40 }
 0xf9e   :  { %v1003_v6 = vpop.f32.mrf.mxu3  ;;  %v983_v54 = vpop.f32.mrf.mxu2 }
 0xf9f   :  { %v1006_v7 = vadd.f32 %v2355_v50, %v1003_v6 }
 0xfa1   :  { %1008 = vst [vmem:[#allocation7 + $0x6] sm:$0x3] %v1006_v7  ;;  %v1011_v8 = vand.u32 2147483647, %v1006_v7  ;;  %vm1010_vm9 = vcmp.ge.s32.totalorder %v1006_v7, 0 }
 0xfa3   :  { %v1012_v9 = vsub.s32 0, %v1011_v8 }
 0xfa5   :  { %v1013_v23 = vsel %vm1010_vm9, %v1006_v7, %v1012_v9 }
 0xfa6   :  { %v1014_v10 = vshra.s32 %v1013_v23, 7 }
 0xfa8   :  { %v1015_v30 = vshll.u32 %v1014_v10, 7 }
 0xfaa   :  { %v1016_v11 = vor.u32 %v1015_v30, %v2359_v56 }
 0xfac   :  { %v1017_v12 = vsel %vm802_vm12, %v1016_v11, 2147483648 }
 0xfad   :  { %v1019_v13 = vshra.s32 %v1017_v12, 16  ;;  %v1018_v15 = vand.u32 65535, %v1017_v12 }
 0xfaf   :  { %v1021_v14 = vcvt.s32.f32 %v1019_v13  ;;  %v1020_v38 = vcvt.s32.f32 %v1018_v15 }
 0xfb1   :  { %1022 = vmax.xlane.f32.xlu1 %v1021_v14 }
0x1024   :  { %v1023_v16 = vpop.xlane.xlu1 %1022 }
0x1025   :  { %vm1024_vm10 = vcmp.eq.f32.partialorder %v1021_v14, %v1023_v16  ;;  %v1029_v40 = vcvt.f32.s32 %v1023_v16 }
0x1026   :  { %v1025_v39 = vsel %vm1024_vm10, %v1020_v38, -inf }
0x1027   :  { %1026 = vmax.xlane.f32.xlu0 %v1025_v39  ;;  %v1030_v33 = vshll.u32 %v1029_v40, 16 }
0x109a   :  { %v1027_v43 = vpop.xlane.xlu0 %1026 }
0x109b   :  { %v1028_v34 = vcvt.f32.s32 %v1027_v43 }
0x109d   :  { %v1031_v35 = vadd.s32 %v1030_v33, %v1028_v34 }
0x109f   :  { %v1032_v36 = vand.u32 127, %v1031_v35 }
0x10a1   :  { %v1033_v37 = vsub.s32 127, %v1032_v36 }
0x10a3   :  { %v1034_v45 = vcvt.s32.f32 %v1033_v37 }
0x10a5   :  { %v1035_v52 = vmul.f32 %v2203_v48, %v1034_v45 }
0x10a7   :  { %v1036_v53 = vadd.f32 %v2198_v47, %v1035_v52 }
0x10a9   :  { %v1037_v55 = vadd.f32 %v1036_v53, %v983_v54 }
0x10ab   :  { %v1038_v57 = vadd.f32 %v1037_v55, %v1037_v55 }
0x10ad   :  { %v1039_v58 = vsel %vm1998_vm4, %v1038_v57, %v1037_v55 }
0x10ae   :  { %v1495_v59 = vmul.f32 -1.442695, %v1039_v58 }
0x10b0   :  { %1587 = vpow2.f32 %v1495_v59 }
0x10b6   :  { %v1588_v60 = vpop.eup %1587 }
0x10b7   :  { %v1043_v61 = vadd.f32 1.0, %v1588_v60 }
0x10b9   :  { %1589 = vrcp.f32 %v1043_v61  ;;  %v1055_v1 = vand.u32 2147483648, %v1043_v61  ;;  %v1053_v3 = vand.u32 2147483647, %v1043_v61  ;;  %vm1049_vm13 = vweird.f32 %v1043_v61 }
0x10bb   :  { %v1056_v22 = vor.u32 1.1754944e-38, %v1055_v1  ;;  %vm1054_vm15 = vcmp.eq.f32.partialorder %v1053_v3, 8.507059e+37 }
0x10bf   :  { %v1590_v62 = vpop.eup %1589 }
0x10c0   :  { %v1045_v63 = vmul.f32 %v1590_v62, %v1043_v61  ;;  %vm1050_vm11 = vweird.f32 %v1590_v62 }
0x10c1   :  { %vm1051_vm14 = vmor %vm1049_vm13, %vm1050_vm11 }
0x10c2   :  { %v1046_v0 = vsub.f32 1.0, %v1045_v63 }
0x10c4   :  { %v1047_v2 = vmul.f32 %v1590_v62, %v1046_v0 }
0x10c6   :  { %v1048_v4 = vadd.f32 %v1590_v62, %v1047_v2 }
0x10c8   :  { %v1052_v5 = vsel %vm1051_vm14, %v1590_v62, %v1048_v4 }
0x10c9   :  { %v1057_v41 = vsel %vm1054_vm15, %v1056_v22, %v1052_v5 }
0x10ca   :  { %v1059_v42 = vadd.f32 %v1057_v41, %v1057_v41 }
0x10cc   :  { %v1496_v20 = vadd.f32 -1.0, %v1059_v42 }
0x10ce   :  { %v1061_v44 = vsel %vm1998_vm4, %v1496_v20, %v1057_v41 }
0x10cf   :  { %1062 = vrot.lane.b32.xlu2 %v1061_v44, %s1749_s30 }
0x10d7   :  { %1064 = vrot.lane.b32.xlu2 %v1061_v44, %s1750_s11 }
0x10df   :  { %1066 = vrot.lane.b32.xlu2 %v1061_v44, %s1748_s3 }
0x1129   :  { %v1063_v46 = vpop.permute.xlu2 %1062 }
0x112a   :  { %v1068_v51 = vmul.f32 %v1063_v46, %v2421_v28 }
0x1131   :  { %v1065_v49 = vpop.permute.xlu2 %1064 }
0x1132   :  { %v1069_v17 = vmul.f32 %v1065_v49, %v1061_v44 }
0x1134   :  { %v2453_v18 = vadd.f32 %v1069_v17, %v1068_v51 }
0x1136   :  { %1591 = vtanh.f32 %v2453_v18 }
0x1139   :  { %v1067_v21 = vpop.permute.xlu2 %1066 }
0x113c   :  { %v1592_v19 = vpop.eup %1591 }
0x113d   :  { %v1072_v24 = vmul.f32 %v1592_v19, %v1067_v21 }
0x113f   :  { %1089 = vmatmul.f32.vlgmr.msra.gmra.mxu0 %v1072_v24  ;;  %1109 = vmatmul.f32.vlgmr.msra.gmra.mxu1 %v1072_v24 }
0x11bc   :  { %v1110_v25 = vpop.f32.mrf.mxu1  ;;  %v1090_v35 = vpop.f32.mrf.mxu0 }
0x11bd   :  { %v1113_v27 = vadd.f32 %v2355_v50, %v1110_v25 }
0x11bf   :  { %1115 = vst [vmem:[#allocation7 + $0x8] sm:$0x3] %v1113_v27  ;;  %v1118_v29 = vand.u32 2147483647, %v1113_v27  ;;  %vm1117_vm0 = vcmp.ge.s32.totalorder %v1113_v27, 0 }
0x11c1   :  { %v1119_v31 = vsub.s32 0, %v1118_v29 }
0x11c3   :  { %v1120_v32 = vsel %vm1117_vm0, %v1113_v27, %v1119_v31 }
0x11c4   :  { %v1121_v6 = vshra.s32 %v1120_v32, 7 }
0x11c6   :  { %v1122_v28 = vshll.u32 %v1121_v6, 7 }
0x11c8   :  { %v1123_v7 = vor.u32 %v1122_v28, %v2359_v56 }
0x11ca   :  { %v1124_v8 = vsel %vm802_vm12, %v1123_v7, 2147483648 }
0x11cb   :  { %v1126_v9 = vshra.s32 %v1124_v8, 16  ;;  %v1125_v10 = vand.u32 65535, %v1124_v8 }
0x11cd   :  { %v1128_v23 = vcvt.s32.f32 %v1126_v9  ;;  %v1127_v11 = vcvt.s32.f32 %v1125_v10 }
0x11cf   :  { %1129 = vmax.xlane.f32.xlu1 %v1128_v23 }
0x1242   :  { %v1130_v30 = vpop.xlane.xlu1 %1129 }
0x1243   :  { %vm1131_vm1 = vcmp.eq.f32.partialorder %v1128_v23, %v1130_v30  ;;  %v1136_v13 = vcvt.f32.s32 %v1130_v30 }
0x1244   :  { %v1132_v12 = vsel %vm1131_vm1, %v1127_v11, -inf }
0x1245   :  { %1133 = vmax.xlane.f32.xlu0 %v1132_v12  ;;  %v1137_v15 = vshll.u32 %v1136_v13, 16  ;;  %v2478_v13 = vld [vmem:[%s2527_s4] ss:$0 sm:$0xff]  ;;  %s1751_s4 = smov [#allocation8]  }
0x12b8   :  { %v1134_v14 = vpop.xlane.xlu0 %1133 }
0x12b9   :  { %v1135_v16 = vcvt.f32.s32 %v1134_v14 }
0x12bb   :  { %v1138_v38 = vadd.s32 %v1137_v15, %v1135_v16  ;;  %v2484_v15 = vld [vmem:[%s2529_s6] ss:$0 sm:$0xff]  ;;  %s1437_s6 = sshll.u32 %s1751_s4, 4  ;;  %s1438_s6 = int_to_ptr.vmem [resolvable:$true] %s1437_s6 }
0x12bd   :  { %v1139_v39 = vand.u32 127, %v1138_v38 }
0x12bf   :  { %v1140_v40 = vsub.s32 127, %v1139_v39 }
0x12c1   :  { %v1141_v43 = vcvt.s32.f32 %v1140_v40 }
0x12c3   :  { %v1142_v33 = vmul.f32 %v2203_v48, %v1141_v43 }
0x12c5   :  { %v1143_v34 = vadd.f32 %v2198_v47, %v1142_v33 }
0x12c7   :  { %v1144_v36 = vadd.f32 %v1143_v34, %v1090_v35 }
0x12c9   :  { %v1145_v37 = vadd.f32 %v1144_v36, %v1144_v36 }
0x12cb   :  { %v1146_v45 = vsel %vm1998_vm4, %v1145_v37, %v1144_v36 }
0x12cc   :  { %v1497_v52 = vmul.f32 -1.442695, %v1146_v45 }
0x12ce   :  { %1593 = vpow2.f32 %v1497_v52 }
0x12d4   :  { %v1594_v53 = vpop.eup %1593 }
0x12d5   :  { %v1150_v54 = vadd.f32 1.0, %v1594_v53 }
0x12d7   :  { %1595 = vrcp.f32 %v1150_v54  ;;  %v1162_v59 = vand.u32 2147483648, %v1150_v54  ;;  %v1160_v48 = vand.u32 2147483647, %v1150_v54  ;;  %vm1156_vm3 = vweird.f32 %v1150_v54 }
0x12d9   :  { %v1163_v47 = vor.u32 1.1754944e-38, %v1162_v59  ;;  %vm1161_vm6 = vcmp.eq.f32.partialorder %v1160_v48, 8.507059e+37 }
0x12dd   :  { %v1596_v55 = vpop.eup %1595 }
0x12de   :  { %v1152_v57 = vmul.f32 %v1596_v55, %v1150_v54  ;;  %vm1157_vm2 = vweird.f32 %v1596_v55 }
0x12df   :  { %vm1158_vm5 = vmor %vm1156_vm3, %vm1157_vm2 }
0x12e0   :  { %v1153_v58 = vsub.f32 1.0, %v1152_v57 }
0x12e2   :  { %v1154_v60 = vmul.f32 %v1596_v55, %v1153_v58 }
0x12e4   :  { %v1155_v61 = vadd.f32 %v1596_v55, %v1154_v60 }
0x12e6   :  { %v1159_v62 = vsel %vm1158_vm5, %v1596_v55, %v1155_v61 }
0x12e7   :  { %v1164_v63 = vsel %vm1161_vm6, %v1163_v47, %v1159_v62 }
0x12e8   :  { %v1166_v0 = vadd.f32 %v1164_v63, %v1164_v63 }
0x12ea   :  { %v1498_v1 = vadd.f32 -1.0, %v1166_v0 }
0x12ec   :  { %v1168_v2 = vsel %vm1998_vm4, %v1498_v1, %v1164_v63 }
0x12ed   :  { %1173 = vrot.lane.b32.xlu0 %v1168_v2, %s1748_s3  ;;  %1171 = vrot.lane.b32.xlu1 %v1168_v2, %s1750_s11 }
0x12ee   :  { %1169 = vrot.lane.b32.xlu2 %v1168_v2, %s1749_s30 }
0x1348   :  { %v1170_v3 = vpop.permute.xlu2 %1169 }
0x1349   :  { %v1175_v22 = vmul.f32 %v1170_v3, %v2453_v18 }
0x135f   :  { %v1172_v4 = vpop.permute.xlu1 %1171  ;;  %v1174_v20 = vpop.permute.xlu0 %1173 }
0x1360   :  { %v1176_v5 = vmul.f32 %v1172_v4, %v1168_v2 }
0x1362   :  { %v2469_v41 = vadd.f32 %v1176_v5, %v1175_v22 }
0x1364   :  { %1597 = vtanh.f32 %v2469_v41 }
0x136a   :  { %v1598_v42 = vpop.eup %1597 }
0x136b   :  { %v1179_v44 = vmul.f32 %v1598_v42, %v1174_v20 }
0x136d   :  { %1196 = vmatmul.f32.vlgmr.msra.gmra.mxu2 %v1179_v44  ;;  %1216 = vmatmul.f32.vlgmr.msra.gmra.mxu3 %v1179_v44 }
0x13f0   :  { %v1217_v46 = vpop.f32.mrf.mxu3  ;;  %v1197_v38 = vpop.f32.mrf.mxu2 }
0x13f1   :  { %v1220_v49 = vadd.f32 %v2355_v50, %v1217_v46 }
0x13f3   :  { %1222 = vst [vmem:[#allocation7 + $0xa] sm:$0x3] %v1220_v49  ;;  %v1225_v51 = vand.u32 2147483647, %v1220_v49  ;;  %vm1224_vm7 = vcmp.ge.s32.totalorder %v1220_v49, 0 }
0x13f5   :  { %v1226_v17 = vsub.s32 0, %v1225_v51 }
0x13f7   :  { %v1227_v19 = vsel %vm1224_vm7, %v1220_v49, %v1226_v17 }
0x13f8   :  { %v1228_v21 = vshra.s32 %v1227_v19, 7 }
0x13fa   :  { %v1229_v18 = vshll.u32 %v1228_v21, 7 }
0x13fc   :  { %v1230_v24 = vor.u32 %v1229_v18, %v2359_v56 }
0x13fe   :  { %v1231_v25 = vsel %vm802_vm12, %v1230_v24, 2147483648 }
0x13ff   :  { %v1233_v27 = vshra.s32 %v1231_v25, 16  ;;  %v1232_v31 = vand.u32 65535, %v1231_v25 }
0x1401   :  { %v1235_v29 = vcvt.s32.f32 %v1233_v27  ;;  %v1234_v6 = vcvt.s32.f32 %v1232_v31 }
0x1403   :  { %1236 = vmax.xlane.f32.xlu2 %v1235_v29 }
0x1476   :  { %v1237_v32 = vpop.xlane.xlu2 %1236 }
0x1477   :  { %vm1238_vm8 = vcmp.eq.f32.partialorder %v1235_v29, %v1237_v32  ;;  %v1243_v7 = vcvt.f32.s32 %v1237_v32 }
0x1478   :  { %v1239_v28 = vsel %vm1238_vm8, %v1234_v6, -inf }
0x1479   :  { %1240 = vmax.xlane.f32.xlu0 %v1239_v28  ;;  %v1244_v9 = vshll.u32 %v1243_v7, 16 }
0x14ec   :  { %v1241_v8 = vpop.xlane.xlu0 %1240 }
0x14ed   :  { %v1242_v23 = vcvt.f32.s32 %v1241_v8 }
0x14ef   :  { %v1245_v10 = vadd.s32 %v1244_v9, %v1242_v23 }
0x14f1   :  { %v1246_v30 = vand.u32 127, %v1245_v10 }
0x14f3   :  { %v1247_v11 = vsub.s32 127, %v1246_v30 }
0x14f5   :  { %v1248_v12 = vcvt.s32.f32 %v1247_v11 }
0x14f7   :  { %v1249_v14 = vmul.f32 %v2478_v13, %v1248_v12 }
0x14f9   :  { %v1250_v16 = vadd.f32 %v2484_v15, %v1249_v14 }
0x14fb   :  { %v1251_v39 = vadd.f32 %v1250_v16, %v1197_v38 }
0x14fd   :  { %v1252_v40 = vadd.f32 %v1251_v39, %v1251_v39 }
0x14ff   :  { %v1253_v43 = vsel %vm1998_vm4, %v1252_v40, %v1251_v39 }
0x1500   :  { %v1499_v33 = vmul.f32 -1.442695, %v1253_v43 }
0x1502   :  { %1599 = vpow2.f32 %v1499_v33 }
0x1508   :  { %v1600_v34 = vpop.eup %1599 }
0x1509   :  { %v1257_v35 = vadd.f32 1.0, %v1600_v34 }
0x150b   :  { %1601 = vrcp.f32 %v1257_v35  ;;  %v1269_v52 = vand.u32 2147483648, %v1257_v35  ;;  %v1267_v54 = vand.u32 2147483647, %v1257_v35  ;;  %vm1263_vm10 = vweird.f32 %v1257_v35 }
0x150d   :  { %v1270_v57 = vor.u32 1.1754944e-38, %v1269_v52  ;;  %vm1268_vm13 = vcmp.eq.f32.partialorder %v1267_v54, 8.507059e+37 }
0x1511   :  { %v1602_v36 = vpop.eup %1601 }
0x1512   :  { %v1259_v37 = vmul.f32 %v1602_v36, %v1257_v35  ;;  %vm1264_vm9 = vweird.f32 %v1602_v36 }
0x1513   :  { %vm1265_vm11 = vmor %vm1263_vm10, %vm1264_vm9 }
0x1514   :  { %v1260_v45 = vsub.f32 1.0, %v1259_v37 }
0x1516   :  { %v1261_v53 = vmul.f32 %v1602_v36, %v1260_v45 }
0x1518   :  { %v1262_v55 = vadd.f32 %v1602_v36, %v1261_v53 }
0x151a   :  { %v1266_v58 = vsel %vm1265_vm11, %v1602_v36, %v1262_v55 }
0x151b   :  { %v1271_v59 = vsel %vm1268_vm13, %v1270_v57, %v1266_v58 }
0x151c   :  { %v1273_v60 = vadd.f32 %v1271_v59, %v1271_v59 }
0x151e   :  { %v1500_v48 = vadd.f32 -1.0, %v1273_v60 }
0x1520   :  { %v1275_v61 = vsel %vm1998_vm4, %v1500_v48, %v1271_v59 }
0x1521   :  { %1276 = vrot.lane.b32.xlu1 %v1275_v61, %s1749_s30 }
0x1529   :  { %1278 = vrot.lane.b32.xlu1 %v1275_v61, %s1750_s11 }
0x1531   :  { %1280 = vrot.lane.b32.xlu1 %v1275_v61, %s1748_s3 }
0x1593   :  { %v1277_v47 = vpop.permute.xlu1 %1276 }
0x1594   :  { %v1282_v63 = vmul.f32 %v1277_v47, %v2469_v41 }
0x159b   :  { %v1279_v62 = vpop.permute.xlu1 %1278 }
0x159c   :  { %v1283_v0 = vmul.f32 %v1279_v62, %v1275_v61 }
0x159e   :  { %v2495_v1 = vadd.f32 %v1283_v0, %v1282_v63 }
0x15a0   :  { %1603 = vtanh.f32 %v2495_v1 }
0x15a3   :  { %v1281_v3 = vpop.permute.xlu1 %1280 }
0x15a6   :  { %v1604_v2 = vpop.eup %1603 }
0x15a7   :  { %v1286_v4 = vmul.f32 %v1604_v2, %v1281_v3 }
0x15a9   :  { %1303 = vmatmul.f32.vlgmr.msrb.gmra.mxu0 %v1286_v4  ;;  %1323 = vmatmul.f32.vlgmr.msrb.gmra.mxu1 %v1286_v4 }
0x1626   :  { %v1324_v22 = vpop.f32.mrf.mxu1  ;;  %v1304_v23 = vpop.f32.mrf.mxu0 }
0x1627   :  { %v1327_v5 = vadd.f32 %v2355_v50, %v1324_v22 }
0x1629   :  { %1329 = vst [vmem:[#allocation7 + $0xc] sm:$0x3] %v1327_v5  ;;  %v1332_v42 = vand.u32 2147483647, %v1327_v5  ;;  %vm1331_vm14 = vcmp.ge.s32.totalorder %v1327_v5, 0 }
0x162b   :  { %v1333_v20 = vsub.s32 0, %v1332_v42 }
0x162d   :  { %v1334_v44 = vsel %vm1331_vm14, %v1327_v5, %v1333_v20 }
0x162e   :  { %v1335_v46 = vshra.s32 %v1334_v44, 7 }
0x1630   :  { %v1336_v41 = vshll.u32 %v1335_v46, 7 }
0x1632   :  { %v1337_v49 = vor.u32 %v1336_v41, %v2359_v56 }
0x1634   :  { %v1338_v51 = vsel %vm802_vm12, %v1337_v49, 2147483648 }
0x1635   :  { %v1340_v17 = vshra.s32 %v1338_v51, 16  ;;  %v1339_v21 = vand.u32 65535, %v1338_v51 }
0x1637   :  { %v1342_v19 = vcvt.s32.f32 %v1340_v17  ;;  %v1341_v24 = vcvt.s32.f32 %v1339_v21 }
0x1639   :  { %1343 = vmax.xlane.f32.xlu2 %v1342_v19 }
0x16ac   :  { %v1344_v18 = vpop.xlane.xlu2 %1343 }
0x16ad   :  { %vm1345_vm15 = vcmp.eq.f32.partialorder %v1342_v19, %v1344_v18  ;;  %v1350_v27 = vcvt.f32.s32 %v1344_v18 }
0x16ae   :  { %v1346_v25 = vsel %vm1345_vm15, %v1341_v24, -inf }
0x16af   :  { %1347 = vmax.xlane.f32.xlu1 %v1346_v25  ;;  %v1351_v31 = vshll.u32 %v1350_v27, 16 }
0x1722   :  { %v1348_v29 = vpop.xlane.xlu1 %1347 }
0x1723   :  { %v1349_v32 = vcvt.f32.s32 %v1348_v29 }
0x1725   :  { %v1352_v6 = vadd.s32 %v1351_v31, %v1349_v32 }
0x1727   :  { %v1353_v28 = vand.u32 127, %v1352_v6 }
0x1729   :  { %v1354_v7 = vsub.s32 127, %v1353_v28 }
0x172b   :  { %v1355_v8 = vcvt.s32.f32 %v1354_v7 }
0x172d   :  { %v1356_v56 = vmul.f32 %v2478_v13, %v1355_v8 }
0x172f   :  { %v1357_v9 = vadd.f32 %v2484_v15, %v1356_v56 }
0x1731   :  { %v1358_v10 = vadd.f32 %v1357_v9, %v1304_v23 }
0x1733   :  { %v1359_v30 = vadd.f32 %v1358_v10, %v1358_v10 }
0x1735   :  { %v1360_v11 = vsel %vm1998_vm4, %v1359_v30, %v1358_v10 }
0x1736   :  { %v1501_v12 = vmul.f32 -1.442695, %v1360_v11 }
0x1738   :  { %1605 = vpow2.f32 %v1501_v12 }
0x173e   :  { %v1606_v14 = vpop.eup %1605 }
0x173f   :  { %v1364_v16 = vadd.f32 1.0, %v1606_v14 }
0x1741   :  { %1607 = vrcp.f32 %v1364_v16  ;;  %v1376_v43 = vand.u32 2147483648, %v1364_v16  ;;  %v1374_v13 = vand.u32 2147483647, %v1364_v16  ;;  %vm1370_vm0 = vweird.f32 %v1364_v16 }
0x1743   :  { %v1377_v15 = vor.u32 1.1754944e-38, %v1376_v43  ;;  %vm1375_vm2 = vcmp.eq.f32.partialorder %v1374_v13, 8.507059e+37 }
0x1747   :  { %v1608_v38 = vpop.eup %1607 }
0x1748   :  { %v1366_v39 = vmul.f32 %v1608_v38, %v1364_v16  ;;  %vm1371_vm12 = vweird.f32 %v1608_v38 }
0x1749   :  { %vm1372_vm1 = vmor %vm1370_vm0, %vm1371_vm12 }
0x174a   :  { %v1367_v40 = vsub.f32 1.0, %v1366_v39 }
0x174c   :  { %v1368_v33 = vmul.f32 %v1608_v38, %v1367_v40 }
0x174e   :  { %v1369_v34 = vadd.f32 %v1608_v38, %v1368_v33 }
0x1750   :  { %v1373_v35 = vsel %vm1372_vm1, %v1608_v38, %v1369_v34 }
0x1751   :  { %v1378_v36 = vsel %vm1375_vm2, %v1377_v15, %v1373_v35 }
0x1752   :  { %v1380_v37 = vadd.f32 %v1378_v36, %v1378_v36 }
0x1754   :  { %v1502_v45 = vadd.f32 -1.0, %v1380_v37 }
0x1756   :  { %v1382_v52 = vsel %vm1998_vm4, %v1502_v45, %v1378_v36 }
0x1757   :  { %1385 = vrot.lane.b32.xlu0 %v1382_v52, %s1750_s11  ;;  %1383 = vrot.lane.b32.xlu2 %v1382_v52, %s1749_s30  ;;  %s1753_s30 = smov [#allocation7]  }
0x1758   :  { %s1423_s11 = sshll.u32 %s1753_s30, 4  ;;  %s1424_s11 = int_to_ptr.vmem [resolvable:$true] %s1423_s11 }
0x175f   :  { %1387 = vrot.lane.b32.xlu2 %v1382_v52, %s1748_s3 }
0x17b1   :  { %v1384_v53 = vpop.permute.xlu2 %1383 }
0x17b2   :  { %v1389_v55 = vmul.f32 %v1384_v53, %v2495_v1 }
0x17b9   :  { %v1388_v60 = vpop.permute.xlu2 %1387 }
0x17c9   :  { %v1386_v54 = vpop.permute.xlu0 %1385 }
0x17ca   :  { %v1390_v57 = vmul.f32 %v1386_v54, %v1382_v52 }
0x17cc   :  { %v1391_v58 = vadd.f32 %v1390_v57, %v1389_v55 }
0x17ce   :  { %1609 = vtanh.f32 %v1391_v58  ;;  %1418 = vst [vmem:[#allocation10] sm:$0x3] %v1391_v58 }
0x17d4   :  { %v1610_v59 = vpop.eup %1609 }
0x17d5   :  { %v1393_v48 = vmul.f32 %v1610_v59, %v1388_v60 }
0x17d7   :  { %1410 = vmatmul.f32.vlgmr.msrb.gmra.mxu2 %v1393_v48  ;;  %1417 = vst [vmem:[#allocation8] sm:$0x3] %v1393_v48 }
0x17d8   :  { %1442 = dma.vmem_to_hbm [thread:$0]  %s1438_s6, 32, %s1440_s24, [#allocation9]  }
0x17d9   :  { %1453 = dma.vmem_to_hbm [thread:$0]  %s1449_s27, 32, %s1451_s2, [#allocation9]  }
0x185a   :  { %v1411_v26 = vpop.f32.mrf.mxu2 }
0x185b   :  { %v1414_v61 = vadd.f32 %v2355_v50, %v1411_v26 }
0x185d   :  { %1416 = vst [vmem:[#allocation7 + $0xe] sm:$0x3] %v1414_v61 }
0x185e   :  { %1431 = dma.vmem_to_hbm [thread:$0]  %s1424_s11, 256, %s1426_s29, [#allocation4], %s1748_s3, %s1748_s3, %s1754_s9  }
0x185f   :  { %1737 = dma.done.wait [#allocation4], 256  }
0x1860   :  { %1738 = vsyncadd [#allocation4], 4294967040 }
0x1861   :  { %1739 = dma.done.wait [#allocation9], 64  }
0x1862   :  { %1740 = vsyncadd [#allocation9], 4294967232 }
0x1863   :  { %1466 = vsyncpa [#allocation3], 1 }
0x1864   :  { %1467 = vsyncpa [#allocation6], 1 }
0x1865   :  { %1468 = vsyncpa [#allocation4], 1 }
0x1866   :  { %1469 = vsyncpa [#allocation9], 1 }

</bundles_post_ra>
